<compile_context>
chip_gen: v7x
topology: tpu7x:2x2x1
jax: 0.10.0
libtpu: 0.0.40
codegen_flags: <defaults>
</compile_context>

<pallas_src>
import functools

import jax
import jax.numpy as jnp
from jax.experimental import pallas as pl
from jax.experimental.pallas import tpu as pltpu


def down_conv_block_kernel(x_ref, tv_ref, w1_ref, w2_ref, b2_ref, ws_ref, mask_ref,
                           out_ref, a_ref, h_ref, acc_ref, *, Wp, Lc, base, bh):
    """One batch sample per grid step. Layout: (channels, flattened padded spatial)."""
    slope = 0.2
    inv_sqrt2 = 0.7071067811865476
    f32 = jnp.float32
    Cout = out_ref.shape[0]

    # LeakyReLU(0.2) of the input, staged once in VMEM so conv1 taps are plain ref slices.
    xv = x_ref[...]
    a_ref[...] = jnp.where(xv >= 0.0, xv, slope * xv)        # zero halo stays zero

    # Keep only the halo-slack strips of the h slab zeroed. Done every step (two small,
    # lane-aligned (Cout, bh) stores) instead of a program_id==0 one-shot init so it stays
    # correct when the parallel batch axis is split across TensorCores (v7x megacore).
    h_ref[:, :bh] = jnp.zeros((Cout, bh), f32)
    h_ref[:, bh + Lc:] = jnp.zeros((Cout, h_ref.shape[1] - bh - Lc), f32)

    # conv1 (3x3, padding=1): 9 shifted-ref-slice MXU matmuls accumulated in f32 directly in
    # the interior of h_ref (first tap assigns -> no interior pre-zeroing needed).
    for t in range(9):
        off = base + (t // 3 - 1) * Wp + (t % 3 - 1)
        c = jnp.dot(w1_ref[t], a_ref[:, off:off + Lc], preferred_element_type=f32)
        if t == 0:
            h_ref[:, bh:bh + Lc] = c
        else:
            h_ref[:, bh:bh + Lc] += c

    # + (b1 + dense_t1(t_emb) + bt) folded wrapper-side into one (Cout,1) vector, then
    # LeakyReLU(0.2); the mask re-zeroes the spatial padding ring and the lane tail.
    hv = h_ref[:, bh:bh + Lc] + tv_ref[...]
    hv = jnp.where(hv >= 0.0, hv, slope * hv) * mask_ref[...]
    h_ref[:, bh:bh + Lc] = hv

    # conv2 (3x3, padding=1): same tap structure, accumulated into an f32 VMEM scratch.
    for t in range(9):
        off = bh + (t // 3 - 1) * Wp + (t % 3 - 1)
        c = jnp.dot(w2_ref[t], h_ref[:, off:off + Lc], preferred_element_type=f32)
        if t == 0:
            acc_ref[...] = c
        else:
            acc_ref[...] += c

    # skip: 1x1 conv (no bias) of the ORIGINAL (unactivated) input, read straight from x_ref.
    skip = jnp.dot(ws_ref[...], x_ref[:, base:base + Lc], preferred_element_type=f32)
    out_ref[...] = ((acc_ref[...] + b2_ref[...] + skip) * inv_sqrt2).astype(out_ref.dtype)


def down_conv_block(x, t_emb, w1, b1, wt, bt, w2, b2, ws):
    """x: (N,Cin,H,W) NCHW; t_emb: (N,T); conv weights in HWIO; wt: (T,Cout). Returns NCHW."""
    N, Cin, H, W = x.shape
    Cout = w1.shape[-1]
    Hp, Wp = H + 2, W + 2
    L0 = Hp * Wp
    Lc = -(-L0 // 128) * 128                   # lane-dense compute/output width (128 multiple)
    base = 2 * Wp                              # leading halo: 2 extra zero rows (>= Wp+1 lanes)
    k_rows = -(-(Wp + 1 + Lc - L0) // Wp)      # extra zero rows below for the trailing halo
    Lslab = (2 + Hp + k_rows) * Wp
    bh = -(-(Wp + 1) // 128) * 128             # 128-aligned halo width of the h scratch slab
    Cin_p = -(-Cin // 8) * 8                   # pad input channels to a full sublane group
    cdt = x.dtype
    f32 = jnp.float32

    # Single fused pad: channel pad + conv padding ring + flattened-lane halo rows.
    x_slab = jnp.pad(x, ((0, 0), (0, Cin_p - Cin), (3, 1 + k_rows), (1, 1))
                     ).reshape(N, Cin_p, Lslab)

    # interior mask over the padded spatial grid (1 = real pixel), tail-padded to Lc lanes
    mask = jnp.zeros((Hp, Wp), f32).at[1:H + 1, 1:W + 1].set(1.0).reshape(1, L0)
    mask = jnp.pad(mask, ((0, 0), (0, Lc - L0)))

    # dense_t1(t_emb) + bt + b1 folded into one per-sample (Cout, 1) vector (wrapper-side).
    tvec = (jnp.dot(t_emb.astype(f32), wt.astype(f32),
                    precision=jax.lax.Precision.HIGHEST)
            + bt.astype(f32) + b1.astype(f32)).reshape(N, Cout, 1)

    # weights in (tap, out, in) matmul layout; input channels zero-padded to Cin_p
    w1_t = jnp.pad(jnp.transpose(w1, (0, 1, 3, 2)),
                   ((0, 0), (0, 0), (0, 0), (0, Cin_p - Cin))
                   ).reshape(9, Cout, Cin_p).astype(cdt)
    w2_t = jnp.transpose(w2, (0, 1, 3, 2)).reshape(9, Cout, Cout).astype(cdt)
    ws_t = jnp.pad(ws.reshape(Cin, Cout), ((0, Cin_p - Cin), (0, 0))).T.astype(cdt)
    b2c = b2.astype(f32).reshape(Cout, 1)

    kernel = functools.partial(down_conv_block_kernel, Wp=Wp, Lc=Lc, base=base, bh=bh)
    out_flat = pl.pallas_call(
        kernel,
        out_shape=jax.ShapeDtypeStruct((N, Cout, Lc), cdt),
        grid=(N,),
        in_specs=[
            pl.BlockSpec((None, Cin_p, Lslab), lambda n: (n, 0, 0)),  # x slab, one sample/step
            pl.BlockSpec((None, Cout, 1), lambda n: (n, 0, 0)),       # folded b1+dense_t1(temb)
            pl.BlockSpec((9, Cout, Cin_p), lambda n: (0, 0, 0)),      # conv1 W (VMEM-resident)
            pl.BlockSpec((9, Cout, Cout), lambda n: (0, 0, 0)),       # conv2 W
            pl.BlockSpec((Cout, 1), lambda n: (0, 0)),                # conv2 b
            pl.BlockSpec((Cout, Cin_p), lambda n: (0, 0)),            # skip 1x1 W
            pl.BlockSpec((1, Lc), lambda n: (0, 0)),                  # interior mask
        ],
        out_specs=pl.BlockSpec((None, Cout, Lc), lambda n: (n, 0, 0)),
        scratch_shapes=[
            pltpu.VMEM((Cin_p, Lslab), cdt),        # activated input slab (conv1 tap source)
            pltpu.VMEM((Cout, Lc + 2 * bh), f32),   # conv1 accumulator / conv2 input slab
            pltpu.VMEM((Cout, Lc), f32),            # conv2 accumulator
        ],
        compiler_params=pltpu.CompilerParams(
            dimension_semantics=("parallel",),
            vmem_limit_bytes=64 * 1024 * 1024),
    )(x_slab, tvec, w1_t, w2_t, b2c, ws_t, mask)

    # (N, Cout, Lc) -> drop the lane tail -> (N, Cout, Hp, Wp) -> crop the conv padding ring
    return out_flat[:, :, :L0].reshape(N, Cout, Hp, Wp)[:, :, 1:H + 1, 1:W + 1]


def reference_forward(x, t_emb, w1, b1, wt, bt, w2, b2, ws):
    """Pure-JAX reference mirroring the PyTorch module (downsample=False)."""
    act = lambda v: jnp.where(v >= 0.0, v, 0.2 * v)
    dn = ("NCHW", "HWIO", "NCHW")
    hi = jax.lax.Precision.HIGHEST
    out = act(x)
    out = jax.lax.conv_general_dilated(out, w1, (1, 1), ((1, 1), (1, 1)),
                                       dimension_numbers=dn, precision=hi)
    out = out + b1[None, :, None, None]
    out = out + (jnp.dot(t_emb, wt, precision=hi) + bt)[:, :, None, None]
    out = act(out)
    out = jax.lax.conv_general_dilated(out, w2, (1, 1), ((1, 1), (1, 1)),
                                       dimension_numbers=dn, precision=hi)
    out = out + b2[None, :, None, None]
    skip = jax.lax.conv_general_dilated(x, ws, (1, 1), ((0, 0), (0, 0)),
                                        dimension_numbers=dn, precision=hi)
    return (out + skip) * 0.7071067811865476


if __name__ == "__main__":
    N, Cin, Cout, H, W, T = 2, 4, 8, 16, 16, 128

    key = jax.random.PRNGKey(0)
    ks = jax.random.split(key, 9)
    x = jax.random.normal(ks[0], (N, Cin, H, W), jnp.float32)
    t_emb = jax.random.normal(ks[1], (N, T), jnp.float32)
    w1 = jax.random.normal(ks[2], (3, 3, Cin, Cout), jnp.float32) * 0.1
    b1 = jax.random.normal(ks[3], (Cout,), jnp.float32) * 0.1
    wt = jax.random.normal(ks[4], (T, Cout), jnp.float32) * 0.1
    bt = jax.random.normal(ks[5], (Cout,), jnp.float32) * 0.1
    w2 = jax.random.normal(ks[6], (3, 3, Cout, Cout), jnp.float32) * 0.1
    b2 = jax.random.normal(ks[7], (Cout,), jnp.float32) * 0.1
    ws = jax.random.normal(ks[8], (1, 1, Cin, Cout), jnp.float32) * 0.1

    out = jax.block_until_ready(down_conv_block(x, t_emb, w1, b1, wt, bt, w2, b2, ws))
    ref = reference_forward(x, t_emb, w1, b1, wt, bt, w2, b2, ws)

    assert out.shape == (N, Cout, H, W), out.shape
    max_err = float(jnp.max(jnp.abs(out - ref)))
    assert jnp.allclose(out, ref, atol=2e-3, rtol=2e-3), f"mismatch vs reference, max|d|={max_err}"
    print("KERNEL_OK")
</pallas_src>

<mosaic_0001>
module attributes {stable_mosaic.version = 11 : i64} {
  func.func @down_conv_block_kernel(%arg0: i32, %arg1: memref<1x8x450xf32, #tpu.memory_space<vmem>>, %arg2: memref<1x8x1xf32, #tpu.memory_space<vmem>>, %arg3: memref<9x8x8xf32, #tpu.memory_space<vmem>>, %arg4: memref<9x8x8xf32, #tpu.memory_space<vmem>>, %arg5: memref<8x1xf32, #tpu.memory_space<vmem>>, %arg6: memref<8x8xf32, #tpu.memory_space<vmem>>, %arg7: memref<1x384xf32, #tpu.memory_space<vmem>>, %arg8: memref<1x8x384xf32, #tpu.memory_space<vmem>>, %arg9: memref<8x450xf32, #tpu.memory_space<vmem>>, %arg10: memref<8x640xf32, #tpu.memory_space<vmem>>, %arg11: memref<8x384xf32, #tpu.memory_space<vmem>>) attributes {dimension_semantics = [#tpu.dimension_semantics<parallel>], iteration_bounds = array<i64: 2>, scalar_prefetch = 0 : i64, scratch_operands = 3 : i64, tpu.core_type = #tpu.core_type<tc>, window_params = [{transform_indices = @transform_0, window_bounds = array<i64: 1, 8, 450>}, {transform_indices = @transform_1, window_bounds = array<i64: 1, 8, 1>}, {pipeline_mode = #tpu.pipeline_mode<synchronous>, transform_indices = @transform_2, window_bounds = array<i64: 9, 8, 8>}, {pipeline_mode = #tpu.pipeline_mode<synchronous>, transform_indices = @transform_3, window_bounds = array<i64: 9, 8, 8>}, {pipeline_mode = #tpu.pipeline_mode<synchronous>, transform_indices = @transform_4, window_bounds = array<i64: 8, 1>}, {pipeline_mode = #tpu.pipeline_mode<synchronous>, transform_indices = @transform_5, window_bounds = array<i64: 8, 8>}, {pipeline_mode = #tpu.pipeline_mode<synchronous>, transform_indices = @transform_6, window_bounds = array<i64: 1, 384>}, {transform_indices = @transform_7, window_bounds = array<i64: 1, 8, 384>}]} {
    %c0 = arith.constant 0 : index
    %c0_0 = arith.constant 0 : index
    %c0_1 = arith.constant 0 : index
    %0 = vector.load %arg1[%c0, %c0_0, %c0_1] : memref<1x8x450xf32, #tpu.memory_space<vmem>>, vector<1x8x450xf32>
    %1 = vector.shape_cast %0 : vector<1x8x450xf32> to vector<8x450xf32>
    %cst = arith.constant 0.000000e+00 : f32
    %2 = vector.broadcast %cst : f32 to vector<8x450xf32>
    %3 = arith.cmpf oge, %1, %2 : vector<8x450xf32>
    %cst_2 = arith.constant 2.000000e-01 : f32
    %4 = vector.broadcast %cst_2 : f32 to vector<8x450xf32>
    %5 = arith.mulf %4, %1 : vector<8x450xf32>
    %6 = arith.select %3, %1, %5 : vector<8x450xi1>, vector<8x450xf32>
    %c0_3 = arith.constant 0 : index
    %c0_4 = arith.constant 0 : index
    %7 = vector.load %arg9[%c0_3, %c0_4] : memref<8x450xf32, #tpu.memory_space<vmem>>, vector<8x450xf32>
    tpu.vector_store %arg9[%c0_3, %c0_4], %6 {strides = array<i32>} : memref<8x450xf32, #tpu.memory_space<vmem>>, vector<8x450xf32>,
    %cst_5 = arith.constant 0.000000e+00 : f32
    %8 = vector.broadcast %cst_5 : f32 to vector<8x128xf32>
    %c0_6 = arith.constant 0 : index
    %c0_7 = arith.constant 0 : index
    %9 = vector.load %arg10[%c0_6, %c0_7] : memref<8x640xf32, #tpu.memory_space<vmem>>, vector<8x128xf32>
    tpu.vector_store %arg10[%c0_6, %c0_7], %8 {strides = array<i32>} : memref<8x640xf32, #tpu.memory_space<vmem>>, vector<8x128xf32>,
    %cst_8 = arith.constant 0.000000e+00 : f32
    %10 = vector.broadcast %cst_8 : f32 to vector<8x128xf32>
    %c0_9 = arith.constant 0 : index
    %c512 = arith.constant 512 : index
    %11 = vector.load %arg10[%c0_9, %c512] : memref<8x640xf32, #tpu.memory_space<vmem>>, vector<8x128xf32>
    tpu.vector_store %arg10[%c0_9, %c512], %10 {strides = array<i32>} : memref<8x640xf32, #tpu.memory_space<vmem>>, vector<8x128xf32>,
    %c0_10 = arith.constant 0 : index
    %c0_11 = arith.constant 0 : index
    %c0_12 = arith.constant 0 : index
    %12 = vector.load %arg3[%c0_10, %c0_11, %c0_12] : memref<9x8x8xf32, #tpu.memory_space<vmem>>, vector<1x8x8xf32>
    %13 = vector.shape_cast %12 : vector<1x8x8xf32> to vector<8x8xf32>
    %c0_13 = arith.constant 0 : index
    %c17 = arith.constant 17 : index
    %14 = vector.load %arg9[%c0_13, %c17] : memref<8x450xf32, #tpu.memory_space<vmem>>, vector<8x384xf32>
    %cst_14 = arith.constant dense<0.000000e+00> : vector<8x384xf32>
    %15 = tpu.matmul %13, %14, %cst_14 {dimension_numbers = #tpu.dot_dimension_numbers<[1], [0], [0], [1], [0, 0, 1, 1], [], []>} : vector<8x8xf32>, vector<8x384xf32>, vector<8x384xf32> -> vector<8x384xf32>
    %c0_15 = arith.constant 0 : index
    %c128 = arith.constant 128 : index
    %16 = vector.load %arg10[%c0_15, %c128] : memref<8x640xf32, #tpu.memory_space<vmem>>, vector<8x384xf32>
    tpu.vector_store %arg10[%c0_15, %c128], %15 {strides = array<i32>} : memref<8x640xf32, #tpu.memory_space<vmem>>, vector<8x384xf32>,
    %c1 = arith.constant 1 : index
    %c0_16 = arith.constant 0 : index
    %c0_17 = arith.constant 0 : index
    %17 = vector.load %arg3[%c1, %c0_16, %c0_17] : memref<9x8x8xf32, #tpu.memory_space<vmem>>, vector<1x8x8xf32>
    %18 = vector.shape_cast %17 : vector<1x8x8xf32> to vector<8x8xf32>
    %c0_18 = arith.constant 0 : index
    %c18 = arith.constant 18 : index
    %19 = vector.load %arg9[%c0_18, %c18] : memref<8x450xf32, #tpu.memory_space<vmem>>, vector<8x384xf32>
    %cst_19 = arith.constant dense<0.000000e+00> : vector<8x384xf32>
    %20 = tpu.matmul %18, %19, %cst_19 {dimension_numbers = #tpu.dot_dimension_numbers<[1], [0], [0], [1], [0, 0, 1, 1], [], []>} : vector<8x8xf32>, vector<8x384xf32>, vector<8x384xf32> -> vector<8x384xf32>
    %c0_20 = arith.constant 0 : index
    %c128_21 = arith.constant 128 : index
    %21 = vector.load %arg10[%c0_20, %c128_21] : memref<8x640xf32, #tpu.memory_space<vmem>>, vector<8x384xf32>
    %22 = arith.addf %21, %20 : vector<8x384xf32>
    %c0_22 = arith.constant 0 : index
    %c128_23 = arith.constant 128 : index
    %23 = vector.load %arg10[%c0_22, %c128_23] : memref<8x640xf32, #tpu.memory_space<vmem>>, vector<8x384xf32>
    tpu.vector_store %arg10[%c0_22, %c128_23], %22 {strides = array<i32>} : memref<8x640xf32, #tpu.memory_space<vmem>>, vector<8x384xf32>,
    %c2 = arith.constant 2 : index
    %c0_24 = arith.constant 0 : index
    %c0_25 = arith.constant 0 : index
    %24 = vector.load %arg3[%c2, %c0_24, %c0_25] : memref<9x8x8xf32, #tpu.memory_space<vmem>>, vector<1x8x8xf32>
    %25 = vector.shape_cast %24 : vector<1x8x8xf32> to vector<8x8xf32>
    %c0_26 = arith.constant 0 : index
    %c19 = arith.constant 19 : index
    %26 = vector.load %arg9[%c0_26, %c19] : memref<8x450xf32, #tpu.memory_space<vmem>>, vector<8x384xf32>
    %cst_27 = arith.constant dense<0.000000e+00> : vector<8x384xf32>
    %27 = tpu.matmul %25, %26, %cst_27 {dimension_numbers = #tpu.dot_dimension_numbers<[1], [0], [0], [1], [0, 0, 1, 1], [], []>} : vector<8x8xf32>, vector<8x384xf32>, vector<8x384xf32> -> vector<8x384xf32>
    %c0_28 = arith.constant 0 : index
    %c128_29 = arith.constant 128 : index
    %28 = vector.load %arg10[%c0_28, %c128_29] : memref<8x640xf32, #tpu.memory_space<vmem>>, vector<8x384xf32>
    %29 = arith.addf %28, %27 : vector<8x384xf32>
    %c0_30 = arith.constant 0 : index
    %c128_31 = arith.constant 128 : index
    %30 = vector.load %arg10[%c0_30, %c128_31] : memref<8x640xf32, #tpu.memory_space<vmem>>, vector<8x384xf32>
    tpu.vector_store %arg10[%c0_30, %c128_31], %29 {strides = array<i32>} : memref<8x640xf32, #tpu.memory_space<vmem>>, vector<8x384xf32>,
    %c3 = arith.constant 3 : index
    %c0_32 = arith.constant 0 : index
    %c0_33 = arith.constant 0 : index
    %31 = vector.load %arg3[%c3, %c0_32, %c0_33] : memref<9x8x8xf32, #tpu.memory_space<vmem>>, vector<1x8x8xf32>
    %32 = vector.shape_cast %31 : vector<1x8x8xf32> to vector<8x8xf32>
    %c0_34 = arith.constant 0 : index
    %c35 = arith.constant 35 : index
    %33 = vector.load %arg9[%c0_34, %c35] : memref<8x450xf32, #tpu.memory_space<vmem>>, vector<8x384xf32>
    %cst_35 = arith.constant dense<0.000000e+00> : vector<8x384xf32>
    %34 = tpu.matmul %32, %33, %cst_35 {dimension_numbers = #tpu.dot_dimension_numbers<[1], [0], [0], [1], [0, 0, 1, 1], [], []>} : vector<8x8xf32>, vector<8x384xf32>, vector<8x384xf32> -> vector<8x384xf32>
    %c0_36 = arith.constant 0 : index
    %c128_37 = arith.constant 128 : index
    %35 = vector.load %arg10[%c0_36, %c128_37] : memref<8x640xf32, #tpu.memory_space<vmem>>, vector<8x384xf32>
    %36 = arith.addf %35, %34 : vector<8x384xf32>
    %c0_38 = arith.constant 0 : index
    %c128_39 = arith.constant 128 : index
    %37 = vector.load %arg10[%c0_38, %c128_39] : memref<8x640xf32, #tpu.memory_space<vmem>>, vector<8x384xf32>
    tpu.vector_store %arg10[%c0_38, %c128_39], %36 {strides = array<i32>} : memref<8x640xf32, #tpu.memory_space<vmem>>, vector<8x384xf32>,
    %c4 = arith.constant 4 : index
    %c0_40 = arith.constant 0 : index
    %c0_41 = arith.constant 0 : index
    %38 = vector.load %arg3[%c4, %c0_40, %c0_41] : memref<9x8x8xf32, #tpu.memory_space<vmem>>, vector<1x8x8xf32>
    %39 = vector.shape_cast %38 : vector<1x8x8xf32> to vector<8x8xf32>
    %c0_42 = arith.constant 0 : index
    %c36 = arith.constant 36 : index
    %40 = vector.load %arg9[%c0_42, %c36] : memref<8x450xf32, #tpu.memory_space<vmem>>, vector<8x384xf32>
    %cst_43 = arith.constant dense<0.000000e+00> : vector<8x384xf32>
    %41 = tpu.matmul %39, %40, %cst_43 {dimension_numbers = #tpu.dot_dimension_numbers<[1], [0], [0], [1], [0, 0, 1, 1], [], []>} : vector<8x8xf32>, vector<8x384xf32>, vector<8x384xf32> -> vector<8x384xf32>
    %c0_44 = arith.constant 0 : index
    %c128_45 = arith.constant 128 : index
    %42 = vector.load %arg10[%c0_44, %c128_45] : memref<8x640xf32, #tpu.memory_space<vmem>>, vector<8x384xf32>
    %43 = arith.addf %42, %41 : vector<8x384xf32>
    %c0_46 = arith.constant 0 : index
    %c128_47 = arith.constant 128 : index
    %44 = vector.load %arg10[%c0_46, %c128_47] : memref<8x640xf32, #tpu.memory_space<vmem>>, vector<8x384xf32>
    tpu.vector_store %arg10[%c0_46, %c128_47], %43 {strides = array<i32>} : memref<8x640xf32, #tpu.memory_space<vmem>>, vector<8x384xf32>,
    %c5 = arith.constant 5 : index
    %c0_48 = arith.constant 0 : index
    %c0_49 = arith.constant 0 : index
    %45 = vector.load %arg3[%c5, %c0_48, %c0_49] : memref<9x8x8xf32, #tpu.memory_space<vmem>>, vector<1x8x8xf32>
    %46 = vector.shape_cast %45 : vector<1x8x8xf32> to vector<8x8xf32>
    %c0_50 = arith.constant 0 : index
    %c37 = arith.constant 37 : index
    %47 = vector.load %arg9[%c0_50, %c37] : memref<8x450xf32, #tpu.memory_space<vmem>>, vector<8x384xf32>
    %cst_51 = arith.constant dense<0.000000e+00> : vector<8x384xf32>
    %48 = tpu.matmul %46, %47, %cst_51 {dimension_numbers = #tpu.dot_dimension_numbers<[1], [0], [0], [1], [0, 0, 1, 1], [], []>} : vector<8x8xf32>, vector<8x384xf32>, vector<8x384xf32> -> vector<8x384xf32>
    %c0_52 = arith.constant 0 : index
    %c128_53 = arith.constant 128 : index
    %49 = vector.load %arg10[%c0_52, %c128_53] : memref<8x640xf32, #tpu.memory_space<vmem>>, vector<8x384xf32>
    %50 = arith.addf %49, %48 : vector<8x384xf32>
    %c0_54 = arith.constant 0 : index
    %c128_55 = arith.constant 128 : index
    %51 = vector.load %arg10[%c0_54, %c128_55] : memref<8x640xf32, #tpu.memory_space<vmem>>, vector<8x384xf32>
    tpu.vector_store %arg10[%c0_54, %c128_55], %50 {strides = array<i32>} : memref<8x640xf32, #tpu.memory_space<vmem>>, vector<8x384xf32>,
    %c6 = arith.constant 6 : index
    %c0_56 = arith.constant 0 : index
    %c0_57 = arith.constant 0 : index
    %52 = vector.load %arg3[%c6, %c0_56, %c0_57] : memref<9x8x8xf32, #tpu.memory_space<vmem>>, vector<1x8x8xf32>
    %53 = vector.shape_cast %52 : vector<1x8x8xf32> to vector<8x8xf32>
    %c0_58 = arith.constant 0 : index
    %c53 = arith.constant 53 : index
    %54 = vector.load %arg9[%c0_58, %c53] : memref<8x450xf32, #tpu.memory_space<vmem>>, vector<8x384xf32>
    %cst_59 = arith.constant dense<0.000000e+00> : vector<8x384xf32>
    %55 = tpu.matmul %53, %54, %cst_59 {dimension_numbers = #tpu.dot_dimension_numbers<[1], [0], [0], [1], [0, 0, 1, 1], [], []>} : vector<8x8xf32>, vector<8x384xf32>, vector<8x384xf32> -> vector<8x384xf32>
    %c0_60 = arith.constant 0 : index
    %c128_61 = arith.constant 128 : index
    %56 = vector.load %arg10[%c0_60, %c128_61] : memref<8x640xf32, #tpu.memory_space<vmem>>, vector<8x384xf32>
    %57 = arith.addf %56, %55 : vector<8x384xf32>
    %c0_62 = arith.constant 0 : index
    %c128_63 = arith.constant 128 : index
    %58 = vector.load %arg10[%c0_62, %c128_63] : memref<8x640xf32, #tpu.memory_space<vmem>>, vector<8x384xf32>
    tpu.vector_store %arg10[%c0_62, %c128_63], %57 {strides = array<i32>} : memref<8x640xf32, #tpu.memory_space<vmem>>, vector<8x384xf32>,
    %c7 = arith.constant 7 : index
    %c0_64 = arith.constant 0 : index
    %c0_65 = arith.constant 0 : index
    %59 = vector.load %arg3[%c7, %c0_64, %c0_65] : memref<9x8x8xf32, #tpu.memory_space<vmem>>, vector<1x8x8xf32>
    %60 = vector.shape_cast %59 : vector<1x8x8xf32> to vector<8x8xf32>
    %c0_66 = arith.constant 0 : index
    %c54 = arith.constant 54 : index
    %61 = vector.load %arg9[%c0_66, %c54] : memref<8x450xf32, #tpu.memory_space<vmem>>, vector<8x384xf32>
    %cst_67 = arith.constant dense<0.000000e+00> : vector<8x384xf32>
    %62 = tpu.matmul %60, %61, %cst_67 {dimension_numbers = #tpu.dot_dimension_numbers<[1], [0], [0], [1], [0, 0, 1, 1], [], []>} : vector<8x8xf32>, vector<8x384xf32>, vector<8x384xf32> -> vector<8x384xf32>
    %c0_68 = arith.constant 0 : index
    %c128_69 = arith.constant 128 : index
    %63 = vector.load %arg10[%c0_68, %c128_69] : memref<8x640xf32, #tpu.memory_space<vmem>>, vector<8x384xf32>
    %64 = arith.addf %63, %62 : vector<8x384xf32>
    %c0_70 = arith.constant 0 : index
    %c128_71 = arith.constant 128 : index
    %65 = vector.load %arg10[%c0_70, %c128_71] : memref<8x640xf32, #tpu.memory_space<vmem>>, vector<8x384xf32>
    tpu.vector_store %arg10[%c0_70, %c128_71], %64 {strides = array<i32>} : memref<8x640xf32, #tpu.memory_space<vmem>>, vector<8x384xf32>,
    %c8 = arith.constant 8 : index
    %c0_72 = arith.constant 0 : index
    %c0_73 = arith.constant 0 : index
    %66 = vector.load %arg3[%c8, %c0_72, %c0_73] : memref<9x8x8xf32, #tpu.memory_space<vmem>>, vector<1x8x8xf32>
    %67 = vector.shape_cast %66 : vector<1x8x8xf32> to vector<8x8xf32>
    %c0_74 = arith.constant 0 : index
    %c55 = arith.constant 55 : index
    %68 = vector.load %arg9[%c0_74, %c55] : memref<8x450xf32, #tpu.memory_space<vmem>>, vector<8x384xf32>
    %cst_75 = arith.constant dense<0.000000e+00> : vector<8x384xf32>
    %69 = tpu.matmul %67, %68, %cst_75 {dimension_numbers = #tpu.dot_dimension_numbers<[1], [0], [0], [1], [0, 0, 1, 1], [], []>} : vector<8x8xf32>, vector<8x384xf32>, vector<8x384xf32> -> vector<8x384xf32>
    %c0_76 = arith.constant 0 : index
    %c128_77 = arith.constant 128 : index
    %70 = vector.load %arg10[%c0_76, %c128_77] : memref<8x640xf32, #tpu.memory_space<vmem>>, vector<8x384xf32>
    %71 = arith.addf %70, %69 : vector<8x384xf32>
    %c0_78 = arith.constant 0 : index
    %c128_79 = arith.constant 128 : index
    %72 = vector.load %arg10[%c0_78, %c128_79] : memref<8x640xf32, #tpu.memory_space<vmem>>, vector<8x384xf32>
    tpu.vector_store %arg10[%c0_78, %c128_79], %71 {strides = array<i32>} : memref<8x640xf32, #tpu.memory_space<vmem>>, vector<8x384xf32>,
    %c0_80 = arith.constant 0 : index
    %c128_81 = arith.constant 128 : index
    %73 = vector.load %arg10[%c0_80, %c128_81] : memref<8x640xf32, #tpu.memory_space<vmem>>, vector<8x384xf32>
    %c0_82 = arith.constant 0 : index
    %c0_83 = arith.constant 0 : index
    %c0_84 = arith.constant 0 : index
    %74 = vector.load %arg2[%c0_82, %c0_83, %c0_84] : memref<1x8x1xf32, #tpu.memory_space<vmem>>, vector<1x8x1xf32>
    %75 = vector.shape_cast %74 : vector<1x8x1xf32> to vector<8x1xf32>
    %76 = vector.broadcast %75 : vector<8x1xf32> to vector<8x384xf32>
    %77 = arith.addf %73, %76 : vector<8x384xf32>
    %cst_85 = arith.constant 0.000000e+00 : f32
    %78 = vector.broadcast %cst_85 : f32 to vector<8x384xf32>
    %79 = arith.cmpf oge, %77, %78 : vector<8x384xf32>
    %cst_86 = arith.constant 2.000000e-01 : f32
    %80 = vector.broadcast %cst_86 : f32 to vector<8x384xf32>
    %81 = arith.mulf %80, %77 : vector<8x384xf32>
    %82 = arith.select %79, %77, %81 : vector<8x384xi1>, vector<8x384xf32>
    %c0_87 = arith.constant 0 : index
    %c0_88 = arith.constant 0 : index
    %83 = vector.load %arg7[%c0_87, %c0_88] : memref<1x384xf32, #tpu.memory_space<vmem>>, vector<1x384xf32>
    %84 = vector.broadcast %83 : vector<1x384xf32> to vector<8x384xf32>
    %85 = arith.mulf %82, %84 : vector<8x384xf32>
    %c0_89 = arith.constant 0 : index
    %c128_90 = arith.constant 128 : index
    %86 = vector.load %arg10[%c0_89, %c128_90] : memref<8x640xf32, #tpu.memory_space<vmem>>, vector<8x384xf32>
    tpu.vector_store %arg10[%c0_89, %c128_90], %85 {strides = array<i32>} : memref<8x640xf32, #tpu.memory_space<vmem>>, vector<8x384xf32>,
    %c0_91 = arith.constant 0 : index
    %c0_92 = arith.constant 0 : index
    %c0_93 = arith.constant 0 : index
    %87 = vector.load %arg4[%c0_91, %c0_92, %c0_93] : memref<9x8x8xf32, #tpu.memory_space<vmem>>, vector<1x8x8xf32>
    %88 = vector.shape_cast %87 : vector<1x8x8xf32> to vector<8x8xf32>
    %c0_94 = arith.constant 0 : index
    %c109 = arith.constant 109 : index
    %89 = vector.load %arg10[%c0_94, %c109] : memref<8x640xf32, #tpu.memory_space<vmem>>, vector<8x384xf32>
    %cst_95 = arith.constant dense<0.000000e+00> : vector<8x384xf32>
    %90 = tpu.matmul %88, %89, %cst_95 {dimension_numbers = #tpu.dot_dimension_numbers<[1], [0], [0], [1], [0, 0, 1, 1], [], []>} : vector<8x8xf32>, vector<8x384xf32>, vector<8x384xf32> -> vector<8x384xf32>
    %c0_96 = arith.constant 0 : index
    %c0_97 = arith.constant 0 : index
    %91 = vector.load %arg11[%c0_96, %c0_97] : memref<8x384xf32, #tpu.memory_space<vmem>>, vector<8x384xf32>
    tpu.vector_store %arg11[%c0_96, %c0_97], %90 {strides = array<i32>} : memref<8x384xf32, #tpu.memory_space<vmem>>, vector<8x384xf32>,
    %c1_98 = arith.constant 1 : index
    %c0_99 = arith.constant 0 : index
    %c0_100 = arith.constant 0 : index
    %92 = vector.load %arg4[%c1_98, %c0_99, %c0_100] : memref<9x8x8xf32, #tpu.memory_space<vmem>>, vector<1x8x8xf32>
    %93 = vector.shape_cast %92 : vector<1x8x8xf32> to vector<8x8xf32>
    %c0_101 = arith.constant 0 : index
    %c110 = arith.constant 110 : index
    %94 = vector.load %arg10[%c0_101, %c110] : memref<8x640xf32, #tpu.memory_space<vmem>>, vector<8x384xf32>
    %cst_102 = arith.constant dense<0.000000e+00> : vector<8x384xf32>
    %95 = tpu.matmul %93, %94, %cst_102 {dimension_numbers = #tpu.dot_dimension_numbers<[1], [0], [0], [1], [0, 0, 1, 1], [], []>} : vector<8x8xf32>, vector<8x384xf32>, vector<8x384xf32> -> vector<8x384xf32>
    %c0_103 = arith.constant 0 : index
    %c0_104 = arith.constant 0 : index
    %96 = vector.load %arg11[%c0_103, %c0_104] : memref<8x384xf32, #tpu.memory_space<vmem>>, vector<8x384xf32>
    %97 = arith.addf %96, %95 : vector<8x384xf32>
    %c0_105 = arith.constant 0 : index
    %c0_106 = arith.constant 0 : index
    %98 = vector.load %arg11[%c0_105, %c0_106] : memref<8x384xf32, #tpu.memory_space<vmem>>, vector<8x384xf32>
    tpu.vector_store %arg11[%c0_105, %c0_106], %97 {strides = array<i32>} : memref<8x384xf32, #tpu.memory_space<vmem>>, vector<8x384xf32>,
    %c2_107 = arith.constant 2 : index
    %c0_108 = arith.constant 0 : index
    %c0_109 = arith.constant 0 : index
    %99 = vector.load %arg4[%c2_107, %c0_108, %c0_109] : memref<9x8x8xf32, #tpu.memory_space<vmem>>, vector<1x8x8xf32>
    %100 = vector.shape_cast %99 : vector<1x8x8xf32> to vector<8x8xf32>
    %c0_110 = arith.constant 0 : index
    %c111 = arith.constant 111 : index
    %101 = vector.load %arg10[%c0_110, %c111] : memref<8x640xf32, #tpu.memory_space<vmem>>, vector<8x384xf32>
    %cst_111 = arith.constant dense<0.000000e+00> : vector<8x384xf32>
    %102 = tpu.matmul %100, %101, %cst_111 {dimension_numbers = #tpu.dot_dimension_numbers<[1], [0], [0], [1], [0, 0, 1, 1], [], []>} : vector<8x8xf32>, vector<8x384xf32>, vector<8x384xf32> -> vector<8x384xf32>
    %c0_112 = arith.constant 0 : index
    %c0_113 = arith.constant 0 : index
    %103 = vector.load %arg11[%c0_112, %c0_113] : memref<8x384xf32, #tpu.memory_space<vmem>>, vector<8x384xf32>
    %104 = arith.addf %103, %102 : vector<8x384xf32>
    %c0_114 = arith.constant 0 : index
    %c0_115 = arith.constant 0 : index
    %105 = vector.load %arg11[%c0_114, %c0_115] : memref<8x384xf32, #tpu.memory_space<vmem>>, vector<8x384xf32>
    tpu.vector_store %arg11[%c0_114, %c0_115], %104 {strides = array<i32>} : memref<8x384xf32, #tpu.memory_space<vmem>>, vector<8x384xf32>,
    %c3_116 = arith.constant 3 : index
    %c0_117 = arith.constant 0 : index
    %c0_118 = arith.constant 0 : index
    %106 = vector.load %arg4[%c3_116, %c0_117, %c0_118] : memref<9x8x8xf32, #tpu.memory_space<vmem>>, vector<1x8x8xf32>
    %107 = vector.shape_cast %106 : vector<1x8x8xf32> to vector<8x8xf32>
    %c0_119 = arith.constant 0 : index
    %c127 = arith.constant 127 : index
    %108 = vector.load %arg10[%c0_119, %c127] : memref<8x640xf32, #tpu.memory_space<vmem>>, vector<8x384xf32>
    %cst_120 = arith.constant dense<0.000000e+00> : vector<8x384xf32>
    %109 = tpu.matmul %107, %108, %cst_120 {dimension_numbers = #tpu.dot_dimension_numbers<[1], [0], [0], [1], [0, 0, 1, 1], [], []>} : vector<8x8xf32>, vector<8x384xf32>, vector<8x384xf32> -> vector<8x384xf32>
    %c0_121 = arith.constant 0 : index
    %c0_122 = arith.constant 0 : index
    %110 = vector.load %arg11[%c0_121, %c0_122] : memref<8x384xf32, #tpu.memory_space<vmem>>, vector<8x384xf32>
    %111 = arith.addf %110, %109 : vector<8x384xf32>
    %c0_123 = arith.constant 0 : index
    %c0_124 = arith.constant 0 : index
    %112 = vector.load %arg11[%c0_123, %c0_124] : memref<8x384xf32, #tpu.memory_space<vmem>>, vector<8x384xf32>
    tpu.vector_store %arg11[%c0_123, %c0_124], %111 {strides = array<i32>} : memref<8x384xf32, #tpu.memory_space<vmem>>, vector<8x384xf32>,
    %c4_125 = arith.constant 4 : index
    %c0_126 = arith.constant 0 : index
    %c0_127 = arith.constant 0 : index
    %113 = vector.load %arg4[%c4_125, %c0_126, %c0_127] : memref<9x8x8xf32, #tpu.memory_space<vmem>>, vector<1x8x8xf32>
    %114 = vector.shape_cast %113 : vector<1x8x8xf32> to vector<8x8xf32>
    %c0_128 = arith.constant 0 : index
    %c128_129 = arith.constant 128 : index
    %115 = vector.load %arg10[%c0_128, %c128_129] : memref<8x640xf32, #tpu.memory_space<vmem>>, vector<8x384xf32>
    %cst_130 = arith.constant dense<0.000000e+00> : vector<8x384xf32>
    %116 = tpu.matmul %114, %115, %cst_130 {dimension_numbers = #tpu.dot_dimension_numbers<[1], [0], [0], [1], [0, 0, 1, 1], [], []>} : vector<8x8xf32>, vector<8x384xf32>, vector<8x384xf32> -> vector<8x384xf32>
    %c0_131 = arith.constant 0 : index
    %c0_132 = arith.constant 0 : index
    %117 = vector.load %arg11[%c0_131, %c0_132] : memref<8x384xf32, #tpu.memory_space<vmem>>, vector<8x384xf32>
    %118 = arith.addf %117, %116 : vector<8x384xf32>
    %c0_133 = arith.constant 0 : index
    %c0_134 = arith.constant 0 : index
    %119 = vector.load %arg11[%c0_133, %c0_134] : memref<8x384xf32, #tpu.memory_space<vmem>>, vector<8x384xf32>
    tpu.vector_store %arg11[%c0_133, %c0_134], %118 {strides = array<i32>} : memref<8x384xf32, #tpu.memory_space<vmem>>, vector<8x384xf32>,
    %c5_135 = arith.constant 5 : index
    %c0_136 = arith.constant 0 : index
    %c0_137 = arith.constant 0 : index
    %120 = vector.load %arg4[%c5_135, %c0_136, %c0_137] : memref<9x8x8xf32, #tpu.memory_space<vmem>>, vector<1x8x8xf32>
    %121 = vector.shape_cast %120 : vector<1x8x8xf32> to vector<8x8xf32>
    %c0_138 = arith.constant 0 : index
    %c129 = arith.constant 129 : index
    %122 = vector.load %arg10[%c0_138, %c129] : memref<8x640xf32, #tpu.memory_space<vmem>>, vector<8x384xf32>
    %cst_139 = arith.constant dense<0.000000e+00> : vector<8x384xf32>
    %123 = tpu.matmul %121, %122, %cst_139 {dimension_numbers = #tpu.dot_dimension_numbers<[1], [0], [0], [1], [0, 0, 1, 1], [], []>} : vector<8x8xf32>, vector<8x384xf32>, vector<8x384xf32> -> vector<8x384xf32>
    %c0_140 = arith.constant 0 : index
    %c0_141 = arith.constant 0 : index
    %124 = vector.load %arg11[%c0_140, %c0_141] : memref<8x384xf32, #tpu.memory_space<vmem>>, vector<8x384xf32>
    %125 = arith.addf %124, %123 : vector<8x384xf32>
    %c0_142 = arith.constant 0 : index
    %c0_143 = arith.constant 0 : index
    %126 = vector.load %arg11[%c0_142, %c0_143] : memref<8x384xf32, #tpu.memory_space<vmem>>, vector<8x384xf32>
    tpu.vector_store %arg11[%c0_142, %c0_143], %125 {strides = array<i32>} : memref<8x384xf32, #tpu.memory_space<vmem>>, vector<8x384xf32>,
    %c6_144 = arith.constant 6 : index
    %c0_145 = arith.constant 0 : index
    %c0_146 = arith.constant 0 : index
    %127 = vector.load %arg4[%c6_144, %c0_145, %c0_146] : memref<9x8x8xf32, #tpu.memory_space<vmem>>, vector<1x8x8xf32>
    %128 = vector.shape_cast %127 : vector<1x8x8xf32> to vector<8x8xf32>
    %c0_147 = arith.constant 0 : index
    %c145 = arith.constant 145 : index
    %129 = vector.load %arg10[%c0_147, %c145] : memref<8x640xf32, #tpu.memory_space<vmem>>, vector<8x384xf32>
    %cst_148 = arith.constant dense<0.000000e+00> : vector<8x384xf32>
    %130 = tpu.matmul %128, %129, %cst_148 {dimension_numbers = #tpu.dot_dimension_numbers<[1], [0], [0], [1], [0, 0, 1, 1], [], []>} : vector<8x8xf32>, vector<8x384xf32>, vector<8x384xf32> -> vector<8x384xf32>
    %c0_149 = arith.constant 0 : index
    %c0_150 = arith.constant 0 : index
    %131 = vector.load %arg11[%c0_149, %c0_150] : memref<8x384xf32, #tpu.memory_space<vmem>>, vector<8x384xf32>
    %132 = arith.addf %131, %130 : vector<8x384xf32>
    %c0_151 = arith.constant 0 : index
    %c0_152 = arith.constant 0 : index
    %133 = vector.load %arg11[%c0_151, %c0_152] : memref<8x384xf32, #tpu.memory_space<vmem>>, vector<8x384xf32>
    tpu.vector_store %arg11[%c0_151, %c0_152], %132 {strides = array<i32>} : memref<8x384xf32, #tpu.memory_space<vmem>>, vector<8x384xf32>,
    %c7_153 = arith.constant 7 : index
    %c0_154 = arith.constant 0 : index
    %c0_155 = arith.constant 0 : index
    %134 = vector.load %arg4[%c7_153, %c0_154, %c0_155] : memref<9x8x8xf32, #tpu.memory_space<vmem>>, vector<1x8x8xf32>
    %135 = vector.shape_cast %134 : vector<1x8x8xf32> to vector<8x8xf32>
    %c0_156 = arith.constant 0 : index
    %c146 = arith.constant 146 : index
    %136 = vector.load %arg10[%c0_156, %c146] : memref<8x640xf32, #tpu.memory_space<vmem>>, vector<8x384xf32>
    %cst_157 = arith.constant dense<0.000000e+00> : vector<8x384xf32>
    %137 = tpu.matmul %135, %136, %cst_157 {dimension_numbers = #tpu.dot_dimension_numbers<[1], [0], [0], [1], [0, 0, 1, 1], [], []>} : vector<8x8xf32>, vector<8x384xf32>, vector<8x384xf32> -> vector<8x384xf32>
    %c0_158 = arith.constant 0 : index
    %c0_159 = arith.constant 0 : index
    %138 = vector.load %arg11[%c0_158, %c0_159] : memref<8x384xf32, #tpu.memory_space<vmem>>, vector<8x384xf32>
    %139 = arith.addf %138, %137 : vector<8x384xf32>
    %c0_160 = arith.constant 0 : index
    %c0_161 = arith.constant 0 : index
    %140 = vector.load %arg11[%c0_160, %c0_161] : memref<8x384xf32, #tpu.memory_space<vmem>>, vector<8x384xf32>
    tpu.vector_store %arg11[%c0_160, %c0_161], %139 {strides = array<i32>} : memref<8x384xf32, #tpu.memory_space<vmem>>, vector<8x384xf32>,
    %c8_162 = arith.constant 8 : index
    %c0_163 = arith.constant 0 : index
    %c0_164 = arith.constant 0 : index
    %141 = vector.load %arg4[%c8_162, %c0_163, %c0_164] : memref<9x8x8xf32, #tpu.memory_space<vmem>>, vector<1x8x8xf32>
    %142 = vector.shape_cast %141 : vector<1x8x8xf32> to vector<8x8xf32>
    %c0_165 = arith.constant 0 : index
    %c147 = arith.constant 147 : index
    %143 = vector.load %arg10[%c0_165, %c147] : memref<8x640xf32, #tpu.memory_space<vmem>>, vector<8x384xf32>
    %cst_166 = arith.constant dense<0.000000e+00> : vector<8x384xf32>
    %144 = tpu.matmul %142, %143, %cst_166 {dimension_numbers = #tpu.dot_dimension_numbers<[1], [0], [0], [1], [0, 0, 1, 1], [], []>} : vector<8x8xf32>, vector<8x384xf32>, vector<8x384xf32> -> vector<8x384xf32>
    %c0_167 = arith.constant 0 : index
    %c0_168 = arith.constant 0 : index
    %145 = vector.load %arg11[%c0_167, %c0_168] : memref<8x384xf32, #tpu.memory_space<vmem>>, vector<8x384xf32>
    %146 = arith.addf %145, %144 : vector<8x384xf32>
    %c0_169 = arith.constant 0 : index
    %c0_170 = arith.constant 0 : index
    %147 = vector.load %arg11[%c0_169, %c0_170] : memref<8x384xf32, #tpu.memory_space<vmem>>, vector<8x384xf32>
    tpu.vector_store %arg11[%c0_169, %c0_170], %146 {strides = array<i32>} : memref<8x384xf32, #tpu.memory_space<vmem>>, vector<8x384xf32>,
    %c0_171 = arith.constant 0 : index
    %c0_172 = arith.constant 0 : index
    %148 = vector.load %arg6[%c0_171, %c0_172] : memref<8x8xf32, #tpu.memory_space<vmem>>, vector<8x8xf32>
    %c0_173 = arith.constant 0 : index
    %c0_174 = arith.constant 0 : index
    %c36_175 = arith.constant 36 : index
    %149 = vector.load %arg1[%c0_173, %c0_174, %c36_175] : memref<1x8x450xf32, #tpu.memory_space<vmem>>, vector<1x8x384xf32>
    %150 = vector.shape_cast %149 : vector<1x8x384xf32> to vector<8x384xf32>
    %cst_176 = arith.constant dense<0.000000e+00> : vector<8x384xf32>
    %151 = tpu.matmul %148, %150, %cst_176 {dimension_numbers = #tpu.dot_dimension_numbers<[1], [0], [0], [1], [0, 0, 1, 1], [], []>} : vector<8x8xf32>, vector<8x384xf32>, vector<8x384xf32> -> vector<8x384xf32>
    %c0_177 = arith.constant 0 : index
    %c0_178 = arith.constant 0 : index
    %152 = vector.load %arg11[%c0_177, %c0_178] : memref<8x384xf32, #tpu.memory_space<vmem>>, vector<8x384xf32>
    %c0_179 = arith.constant 0 : index
    %c0_180 = arith.constant 0 : index
    %153 = vector.load %arg5[%c0_179, %c0_180] : memref<8x1xf32, #tpu.memory_space<vmem>>, vector<8x1xf32>
    %154 = vector.broadcast %153 : vector<8x1xf32> to vector<8x384xf32>
    %155 = arith.addf %152, %154 : vector<8x384xf32>
    %156 = arith.addf %155, %151 : vector<8x384xf32>
    %cst_181 = arith.constant 0.707106769 : f32
    %157 = vector.broadcast %cst_181 : f32 to vector<8x384xf32>
    %158 = arith.mulf %156, %157 : vector<8x384xf32>
    %c0_182 = arith.constant 0 : index
    %c0_183 = arith.constant 0 : index
    %c0_184 = arith.constant 0 : index
    %159 = vector.load %arg8[%c0_182, %c0_183, %c0_184] : memref<1x8x384xf32, #tpu.memory_space<vmem>>, vector<1x8x384xf32>
    %160 = vector.shape_cast %159 : vector<1x8x384xf32> to vector<8x384xf32>
    %161 = vector.shape_cast %158 : vector<8x384xf32> to vector<1x8x384xf32>
    tpu.vector_store %arg8[%c0_182, %c0_183, %c0_184], %161 {strides = array<i32>} : memref<1x8x384xf32, #tpu.memory_space<vmem>>, vector<1x8x384xf32>,
    return
  }
  func.func @transform_0(%arg0: i32) -> (i32, i32, i32) {
    %c0_i32 = arith.constant 0 : i32
    %c0_i32_0 = arith.constant 0 : i32
    %c0_i32_1 = arith.constant 0 : i32
    return %arg0, %c0_i32, %c0_i32_0 : i32, i32, i32
  }
  func.func @transform_1(%arg0: i32) -> (i32, i32, i32) {
    %c0_i32 = arith.constant 0 : i32
    %c0_i32_0 = arith.constant 0 : i32
    %c0_i32_1 = arith.constant 0 : i32
    return %arg0, %c0_i32, %c0_i32_0 : i32, i32, i32
  }
  func.func @transform_2(%arg0: i32) -> (i32, i32, i32) {
    %c0_i32 = arith.constant 0 : i32
    %c0_i32_0 = arith.constant 0 : i32
    %c0_i32_1 = arith.constant 0 : i32
    %c0_i32_2 = arith.constant 0 : i32
    return %c0_i32, %c0_i32_0, %c0_i32_1 : i32, i32, i32
  }
  func.func @transform_3(%arg0: i32) -> (i32, i32, i32) {
    %c0_i32 = arith.constant 0 : i32
    %c0_i32_0 = arith.constant 0 : i32
    %c0_i32_1 = arith.constant 0 : i32
    %c0_i32_2 = arith.constant 0 : i32
    return %c0_i32, %c0_i32_0, %c0_i32_1 : i32, i32, i32
  }
  func.func @transform_4(%arg0: i32) -> (i32, i32) {
    %c0_i32 = arith.constant 0 : i32
    %c0_i32_0 = arith.constant 0 : i32
    %c0_i32_1 = arith.constant 0 : i32
    return %c0_i32, %c0_i32_0 : i32, i32
  }
  func.func @transform_5(%arg0: i32) -> (i32, i32) {
    %c0_i32 = arith.constant 0 : i32
    %c0_i32_0 = arith.constant 0 : i32
    %c0_i32_1 = arith.constant 0 : i32
    return %c0_i32, %c0_i32_0 : i32, i32
  }
  func.func @transform_6(%arg0: i32) -> (i32, i32) {
    %c0_i32 = arith.constant 0 : i32
    %c0_i32_0 = arith.constant 0 : i32
    %c0_i32_1 = arith.constant 0 : i32
    return %c0_i32, %c0_i32_0 : i32, i32
  }
  func.func @transform_7(%arg0: i32) -> (i32, i32, i32) {
    %c0_i32 = arith.constant 0 : i32
    %c0_i32_0 = arith.constant 0 : i32
    %c0_i32_1 = arith.constant 0 : i32
    return %arg0, %c0_i32, %c0_i32_0 : i32, i32, i32
  }
}

</mosaic_0001>

<bundles_post_ra>
// kernel: tpu_custom_call.1
= control target key start
LH: loop header
LB: loop body
LE: loop exit
PB: predicated region body
PF: predicated region fallthrough
CT: control target
= control target key end

     0   :  { %s5295_s0 = inlined_call_operand.hbm [shape: f32[2,8,450], index: 0, kind: input, shape index: {}]   ;;  %s5296_s1 = inlined_call_operand.hbm [shape: f32[2,8,1], index: 1, kind: input, shape index: {}]   ;;  %s5297_s2 = inlined_call_operand.hbm [shape: f32[9,8,8], index: 2, kind: input, shape index: {}]   ;;  %s5298_s3 = inlined_call_operand.hbm [shape: f32[9,8,8], index: 3, kind: input, shape index: {}]   ;;  %s5299_s4 = inlined_call_operand.hbm [shape: f32[8,1], index: 4, kind: input, shape index: {}]   ;;  %s5300_s5 = inlined_call_operand.hbm [shape: f32[8,8], index: 5, kind: input, shape index: {}]   ;;  %s5301_s6 = inlined_call_operand.hbm [shape: f32[1,384], index: 6, kind: input, shape index: {}]   ;;  %s5302_s7 = inlined_call_operand.hbm [shape: f32[2,8,384], index: 7, kind: output, shape index: {}]  }
   0x1   :  { %5307 = sst [smem:[#allocation24_spill]] %s5295_s0 }
   0x2   :  { %5308 = sst [smem:[#allocation25_spill]] %s5297_s2 }
   0x3   :  { %5309 = sst [smem:[#allocation26_spill]] %s5298_s3 }
   0x4   :  { %12 = vsyncpa [#allocation6], 0 }
   0x5   :  { %14 = vsyncpa [#allocation6 + $0x1], 0 }
   0x6   :  { %15 = vsyncpa [#allocation9], 0 }
   0x7   :  { %17 = vsyncpa [#allocation9 + $0x1], 0 }
   0x8   :  { %18 = vsyncpa [#allocation12], 0 }
   0x9   :  { %19 = vsyncpa [#allocation15], 0 }
   0xa   :  { %20 = vsyncpa [#allocation7], 0 }
   0xb   :  { %22 = vsyncpa [#allocation7 + $0x1], 0  ;;  %s4702_s24 = smov 0   ;;  %s4704_s25 = smov 0  }
   0xc   :  { %s4706_s26 = smov 0   ;;  %s4708_s27 = smov 0  }
   0xd LB: > { %s4635_s28 = smov [#allocation10]   ;;  %s4723_s30 = sadd.s32 4294967295, %s4633_s27   ;;  %s4633_s27 = sphi %s4708_s27, %s5336_s27   ;;  %s4629_s26 = sphi %s4706_s26, %s5335_s26   ;;  %s4625_s25 = sphi %s4704_s25, %s5334_s25   ;;  %s4621_s24 = sphi %s4702_s24, %s5333_s24  }
   0xe   : > { %s228_s29 = sshll.u32 %s4635_s28, 4  ;;  %p3977_p0 = scmp.ge.s32.totalorder %s4633_s27, 1  ;;  %s4728_s29 = int_to_ptr.vmem [resolvable:$true] %s228_s29 }
   0xf   : > { %p5303_p1 = scmp.eq.s32.totalorder %s4723_s30, 0  ;;  %p216_p2 = scmp.lt.s32.totalorder %s4633_s27, 3 }
  0x10   : > { %s4636_s9 = smov [#allocation11]   ;;  %s4637_s12 = smov [#allocation14]  }
  0x11   : > { %p4730_p3 = pnand %p3977_p0, %p216_p2  ;;  %s241_s10 = sshll.u32 %s4636_s9, 4  ;;  %s4743_s10 = int_to_ptr.vmem [resolvable:$true] %s241_s10 }
  0x12   : > { %s266_s13 = sshll.u32 %s4637_s12, 4  ;;  %s5312_s2 = sld [smem:[#allocation25_spill]]  ;;  %s4745_s13 = int_to_ptr.vmem [resolvable:$true] %s266_s13 }
  0x13   : > { %s5310_s8 = scalar_select %p4730_p3, 1, 0 }
  0x14   : > { %p4255_p5 = pneg %p4730_p3 }
  0x16   : > { %p4739_p6 = pnand %p4255_p5, %p5303_p1 }
  0x18   : > { %s4351_s16 = scalar_lea.hbm %s5312_s2, 1152  ;;  %p4755_p8 = pneg %p4739_p6 }
  0x19   : > { %p4352_p7 = scmp.ne.s32.totalorder %s5312_s2, %s4351_s16  ;;  %p4358_p11 = scmp.lt.u32.totalorder %s4351_s16, %s5312_s2 }
  0x1b   : > { %p4354_p9 = pnand %p4755_p8, %p4352_p7 }
  0x1d   : > { %p4355_p10 = pneg %p4354_p9 }
  0x1f   : > { %p4360_p12 = pnand %p4358_p11, %p4355_p10 }
  0x21   : > { %4363 = shalt.err (!%p4360_p12)
}
  0x22   : > { %s4364_s22 = scalar_lea.vmem %s4728_s29, 1152  ;;  %p4372_p5 = scmp.lt.s32.totalorder %s4728_s29, %s4728_s29 }
  0x23   : > { %p4365_p13 = scmp.ne.s32.totalorder %s4728_s29, %s4364_s22  ;;  %p4373_p4 = scmp.lt.s32.totalorder %s4364_s22, %s4364_s22 }
  0x25   : > { %p4367_p0 = pnand %p4365_p13, %p4755_p8  ;;  %p4374_p7 = por %p4373_p4, %p4372_p5 }
  0x27   : > { %p4368_p2 = pneg %p4367_p0 }
  0x29   : > { %p4375_p9 = pnand %p4374_p7, %p4368_p2 }
  0x2b   : > { %4378 = shalt.err (!%p4375_p9)
}
  0x2c   : > { %s4638_s23 = smov 128   ;;  %s4639_s28 = smov 8  }
  0x2d   : > { %4258 = dma.hbm_to_vmem [thread:$0]  (!%p4739_p6), %s5312_s2, 1152, %s4728_s29, [#allocation9], %s4638_s23, %s4638_s23, %s4639_s28  }
  0x2e   : > { %s5314_s3 = sld [smem:[#allocation26_spill]] }
  0x34   : > { %s4379_s16 = scalar_lea.hbm %s5314_s3, 1152 }
  0x35   : > { %p4380_p4 = scmp.ne.s32.totalorder %s5314_s3, %s4379_s16  ;;  %p4386_p12 = scmp.lt.u32.totalorder %s4379_s16, %s5314_s3 }
  0x37   : > { %p4382_p10 = pnand %p4380_p4, %p4755_p8 }
  0x39   : > { %p4383_p11 = pneg %p4382_p10 }
  0x3b   : > { %p4388_p13 = pnand %p4386_p12, %p4383_p11 }
  0x3d   : > { %4391 = shalt.err (!%p4388_p13)
}
  0x3e   : > { %s4392_s29 = scalar_lea.vmem %s4743_s10, 1152  ;;  %p4400_p7 = scmp.lt.s32.totalorder %s4743_s10, %s4743_s10 }
  0x3f   : > { %p4393_p0 = scmp.ne.s32.totalorder %s4743_s10, %s4392_s29  ;;  %p4401_p9 = scmp.lt.s32.totalorder %s4392_s29, %s4392_s29 }
  0x41   : > { %p4395_p2 = pnand %p4393_p0, %p4755_p8  ;;  %p4402_p4 = por %p4401_p9, %p4400_p7 }
  0x43   : > { %p4396_p5 = pneg %p4395_p2 }
  0x45   : > { %p4403_p10 = pnand %p4402_p4, %p4396_p5 }
  0x47   : > { %4406 = shalt.err (!%p4403_p10)
}
  0x48   : > { %4261 = dma.hbm_to_vmem [thread:$0]  (!%p4739_p6), %s5314_s3, 1152, %s4743_s10, [#allocation12], %s4638_s23, %s4638_s23, %s4639_s28  }
  0x49   : > { %s4407_s15 = scalar_lea.hbm %s5300_s5, 128 }
  0x4a   : > { %p4408_p11 = scmp.ne.s32.totalorder %s5300_s5, %s4407_s15  ;;  %p4414_p0 = scmp.lt.u32.totalorder %s4407_s15, %s5300_s5 }
  0x4c   : > { %p4410_p12 = pnand %p4408_p11, %p4755_p8 }
  0x4e   : > { %p4411_p13 = pneg %p4410_p12 }
  0x50   : > { %p4416_p2 = pnand %p4414_p0, %p4411_p13 }
  0x52   : > { %4419 = shalt.err (!%p4416_p2)
}
  0x53   : > { %s4420_s10 = scalar_lea.vmem %s4745_s13, 128  ;;  %p4428_p4 = scmp.lt.s32.totalorder %s4745_s13, %s4745_s13 }
  0x54   : > { %p4421_p5 = scmp.ne.s32.totalorder %s4745_s13, %s4420_s10  ;;  %p4429_p10 = scmp.lt.s32.totalorder %s4420_s10, %s4420_s10 }
  0x56   : > { %p4423_p7 = pnand %p4421_p5, %p4755_p8  ;;  %p4430_p11 = por %p4429_p10, %p4428_p4 }
  0x58   : > { %p4424_p9 = pneg %p4423_p7 }
  0x5a   : > { %p4431_p12 = pnand %p4430_p11, %p4424_p9 }
  0x5c   : > { %4434 = shalt.err (!%p4431_p12)
}
  0x5d   : > { %4267 = dma.hbm_to_vmem [thread:$0]  (!%p4739_p6), %s5300_s5, 128, %s4745_s13, [#allocation15]  }
  0x5e   : > { %s4640_s21 = smov [#allocation13]   ;;  %s4641_s22 = smov [#allocation16]  }
  0x5f   : > { %s255_s29 = sshll.u32 %s4640_s21, 4  ;;  %s277_s9 = sshll.u32 %s4641_s22, 4  ;;  %s256_s29 = int_to_ptr.vmem [resolvable:$true] %s255_s29  ;;  %s278_s9 = int_to_ptr.vmem [resolvable:$true] %s277_s9 }
  0x60   : > { %s4435_s15 = scalar_lea.hbm %s5299_s4, 128 }
  0x61   : > { %p4436_p13 = scmp.ne.s32.totalorder %s5299_s4, %s4435_s15  ;;  %p4442_p5 = scmp.lt.u32.totalorder %s4435_s15, %s5299_s4 }
  0x63   : > { %p4438_p0 = pnand %p4436_p13, %p4755_p8 }
  0x65   : > { %p4439_p2 = pneg %p4438_p0 }
  0x67   : > { %p4444_p7 = pnand %p4442_p5, %p4439_p2 }
  0x69   : > { %4447 = shalt.err (!%p4444_p7)
}
  0x6a   : > { %s4448_s13 = scalar_lea.vmem %s256_s29, 128  ;;  %p4456_p11 = scmp.lt.s32.totalorder %s256_s29, %s256_s29 }
  0x6b   : > { %p4449_p9 = scmp.ne.s32.totalorder %s256_s29, %s4448_s13  ;;  %p4457_p12 = scmp.lt.s32.totalorder %s4448_s13, %s4448_s13 }
  0x6d   : > { %p4451_p4 = pnand %p4449_p9, %p4755_p8  ;;  %p4458_p1 = por %p4457_p12, %p4456_p11 }
  0x6f   : > { %p4452_p10 = pneg %p4451_p4 }
  0x71   : > { %p4459_p3 = pnand %p4458_p1, %p4452_p10 }
  0x73   : > { %4462 = shalt.err (!%p4459_p3)
}
  0x74   : > { %4264 = dma.hbm_to_vmem [thread:$0]  (!%p4739_p6), %s5299_s4, 128, %s256_s29, [#allocation12]  }
  0x75   : > { %s4463_s22 = scalar_lea.hbm %s5301_s6, 48 }
  0x76   : > { %p4464_p13 = scmp.ne.s32.totalorder %s5301_s6, %s4463_s22  ;;  %p4470_p3 = scmp.lt.u32.totalorder %s4463_s22, %s5301_s6 }
  0x78   : > { %p4466_p0 = pnand %p4464_p13, %p4755_p8 }
  0x7a   : > { %p4467_p1 = pneg %p4466_p0 }
  0x7c   : > { %p4472_p2 = pnand %p4470_p3, %p4467_p1 }
  0x7e   : > { %4475 = shalt.err (!%p4472_p2)
}
  0x7f   : > { %s4476_s17 = scalar_lea.vmem %s278_s9, 48  ;;  %s4483_s29 = scalar_lea.vmem %s278_s9, 64 }
  0x80   : > { %p4477_p5 = scmp.ne.s32.totalorder %s278_s9, %s4476_s17  ;;  %p4484_p4 = scmp.lt.s32.totalorder %s278_s9, %s278_s9 }
  0x81   : > { %p4485_p10 = scmp.lt.s32.totalorder %s4483_s29, %s4476_s17 }
  0x82   : > { %p4479_p7 = pnand %p4477_p5, %p4755_p8 }
  0x83   : > { %p4486_p11 = por %p4485_p10, %p4484_p4 }
  0x84   : > { %p4480_p9 = pneg %p4479_p7 }
  0x86   : > { %p4487_p12 = pnand %p4486_p11, %p4480_p9 }
  0x88   : > { %4490 = shalt.err (!%p4487_p12)
}
  0x89   : > { %4270 = dma.hbm_to_vmem [thread:$0]  (!%p4739_p6), %s5301_s6, 48, %s278_s9, [#allocation15]  }
  0x8a   : > { %s3976_s19 = sadd.s32 4294967294, %s4633_s27   ;;  %s4860_s11 = sadd.s32 1, %s4633_s27  }
  0x8b   : > { %s35_s13 = sadd.s32 1, %s4629_s26  ;;  %s32_s10 = ssub.s32 %s4633_s27, %s4860_s11 }
  0x8c   : > { %p42_p8 = scmp.ne.s32.totalorder %s4629_s26, %s4625_s25  ;;  %p33_p13 = scmp.eq.s32.totalorder %s32_s10, 0 }
  0x8d   : > { %p43_p0 = scmp.eq.s32.totalorder %s4633_s27, 0  ;;  %p48_p1 = scmp.ne.s32.totalorder %s4625_s25, %s4621_s24 }
  0x8e   : > { %p203_p3 = scmp.eq.s32.totalorder %s4723_s30, 1  ;;  %p5315_p5 = scmp.eq.s32.totalorder %s4723_s30, 0 }
  0x8f   : > { %s4872_s23 = scalar_select %p33_p13, %s4629_s26, %s35_s13  }
  0x90   : > { %p44_p2 = por %p43_p0, %p42_p8  ;;  %p4876_p7 = por %p5315_p5, %p48_p1 }
  0x91   : > { %p4880_p6 = por %p203_p3, %p42_p8  ;;  %p209_p9 = scmp.eq.s32.totalorder %s3976_s19, 1 }
  0x92   : > { %s5316_s9 = scalar_select %p4876_p7, 1, 0 }
  0x93   : > { %s5317_s28 = scalar_select %p4880_p6, 1, 0 }
  0x94   : > { %p4287_p4 = scmp.lt.s32.totalorder %s4633_s27, 2  ;;  %s4886_s21 = sand.u32 1, %s4629_s26  }
  0x95   : > { %p4888_p10 = por %p209_p9, %p48_p1  ;;  %s3984_s12 = sshll.u32 %s4886_s21, 5 }
  0x96   : > { %s4038_s14 = sshll.u32 %s4633_s27, 9  ;;  %s5319_s0 = sld [smem:[#allocation24_spill]] }
  0x97   : > { %s5318_s22 = scalar_select %p4888_p10, 1, 0 }
  0x98   : > { %s292_s29 = scalar_lea.vmem [#allocation5], %s3984_s12  ;;  %p4899_p11 = pnand %p4287_p4, %p44_p2 }
  0x99   : > { %s300_s18 = sshll.u32 %s292_s29, 4  ;;  %s289_s13 = scalar_lea.sflag [#allocation6], %s4886_s21  ;;  %s4903_s18 = int_to_ptr.vmem [resolvable:$true] %s300_s18 }
  0x9a   : > { %p4493_p8 = pneg %p4899_p11 }
  0x9c   : > { %s4897_s17 = scalar_lea.hbm %s5319_s0, %s4038_s14  ;;  %s4496_s15 = scalar_lea.hbm %s5319_s0, 1024 }
  0x9d   : > { %s4491_s10 = scalar_lea.hbm %s4897_s17, 512  ;;  %p4497_p1 = scmp.lt.u32.totalorder %s4897_s17, %s5319_s0 }
  0x9e   : > { %p4492_p12 = scmp.ne.s32.totalorder %s4897_s17, %s4491_s10  ;;  %p4498_p3 = scmp.lt.u32.totalorder %s4496_s15, %s4491_s10 }
  0x9f   : > { %p4500_p5 = scmp.lt.u32.totalorder %s4491_s10, %s4897_s17 }
  0xa0   : > { %p4494_p13 = pnand %p4493_p8, %p4492_p12  ;;  %p4499_p2 = por %p4498_p3, %p4497_p1 }
  0xa2   : > { %p4495_p0 = pneg %p4494_p13  ;;  %p4501_p9 = por %p4500_p5, %p4499_p2 }
  0xa4   : > { %p4502_p4 = pnand %p4501_p9, %p4495_p0 }
  0xa6   : > { %4505 = shalt.err (!%p4502_p4)
}
  0xa7   : > { %s4506_s19 = scalar_lea.vmem %s4903_s18, 512  ;;  %s4642_s12 = smov [#allocation5]  }
  0xa8   : > { %p4507_p12 = scmp.ne.s32.totalorder %s4903_s18, %s4506_s19  ;;  %s4511_s14 = sshll.u32 %s4642_s12, 4  ;;  %s4512_s14 = int_to_ptr.vmem [resolvable:$false] %s4511_s14 }
  0xa9   : > { %s4513_s16 = scalar_lea.vmem %s4512_s14, 1024  ;;  %p4514_p6 = scmp.lt.s32.totalorder %s4903_s18, %s4512_s14 }
  0xaa   : > { %p4509_p13 = pnand %p4507_p12, %p4493_p8  ;;  %p4515_p1 = scmp.lt.s32.totalorder %s4513_s16, %s4506_s19 }
  0xac   : > { %p4510_p10 = pneg %p4509_p13  ;;  %p4516_p3 = por %p4515_p1, %p4514_p6 }
  0xae   : > { %p4517_p2 = pnand %p4516_p3, %p4510_p10 }
  0xb0   : > { %4520 = shalt.err (!%p4517_p2)
}
  0xb1   : > { %4274 = dma.hbm_to_vmem [thread:$0]  (!%p4899_p11), %s4897_s17, 512, %s4903_s18, %s289_s13  }
  0xb2   : > { %s3987_s10 = sshll.u32 %s4886_s21, 3  ;;  %s3988_s15 = sshll.u32 %s4633_s27, 7 }
  0xb3   : > { %s4937_s0 = scalar_lea.hbm %s5296_s1, %s3988_s15  ;;  %s311_s19 = scalar_lea.vmem [#allocation8], %s3987_s10 }
  0xb4   : > { %s318_s14 = sshll.u32 %s311_s19, 4  ;;  %s5321_s16 = sand.u32 1, %s4633_s27   ;;  %s319_s14 = int_to_ptr.vmem [resolvable:$true] %s318_s14 }
  0xb5   : > { %s308_s2 = scalar_lea.sflag [#allocation9], %s5321_s16  ;;  %s4521_s3 = scalar_lea.hbm %s4937_s0, 128 }
  0xb6   : > { %p4522_p6 = scmp.ne.s32.totalorder %s4937_s0, %s4521_s3  ;;  %s4526_s18 = scalar_lea.hbm %s5296_s1, 256 }
  0xb7   : > { %p4527_p5 = scmp.lt.u32.totalorder %s4937_s0, %s5296_s1  ;;  %p4528_p9 = scmp.lt.u32.totalorder %s4526_s18, %s4521_s3 }
  0xb8   : > { %p4524_p10 = pnand %p4522_p6, %p4493_p8  ;;  %p4530_p12 = scmp.lt.u32.totalorder %s4521_s3, %s4937_s0 }
  0xb9   : > { %p4529_p4 = por %p4528_p9, %p4527_p5 }
  0xba   : > { %p4525_p0 = pneg %p4524_p10 }
  0xbb   : > { %p4531_p13 = por %p4530_p12, %p4529_p4 }
  0xbd   : > { %p4532_p1 = pnand %p4531_p13, %p4525_p0 }
  0xbf   : > { %4535 = shalt.err (!%p4532_p1)
}
  0xc0   : > { %s4536_s10 = scalar_lea.vmem %s319_s14, 128  ;;  %s4643_s29 = smov [#allocation8]  }
  0xc1   : > { %p4537_p3 = scmp.ne.s32.totalorder %s319_s14, %s4536_s10  ;;  %s4541_s12 = sshll.u32 %s4643_s29, 4  ;;  %s4542_s12 = int_to_ptr.vmem [resolvable:$false] %s4541_s12 }
  0xc2   : > { %s4543_s19 = scalar_lea.vmem %s4542_s12, 256  ;;  %p4544_p10 = scmp.lt.s32.totalorder %s319_s14, %s4542_s12 }
  0xc3   : > { %p4539_p2 = pnand %p4537_p3, %p4493_p8  ;;  %p4545_p7 = scmp.lt.s32.totalorder %s4543_s19, %s4536_s10 }
  0xc5   : > { %p4540_p6 = pneg %p4539_p2  ;;  %p4546_p5 = por %p4545_p7, %p4544_p10 }
  0xc7   : > { %p4547_p9 = pnand %p4546_p5, %p4540_p6 }
  0xc9   : > { %4550 = shalt.err (!%p4547_p9)
}
  0xca   : > { %4277 = dma.hbm_to_vmem [thread:$0]  (!%p4899_p11), %s4937_s0, 128, %s319_s14, %s308_s2  }
  0xcb   : > { %p5322_p0 = scmp.ne.s32.totalorder %s5310_s8, 0 }
  0xcc   : > { %s4963_s3 = sand.u32 (!%p5322_p0), 1, %s4625_s25   ;;  %p5323_p8 = scmp.ne.s32.totalorder (!%p5322_p0), %s5316_s9, 0 }
  0xcd   : > { %327 = sbr.rel (%p5322_p0) target bundleno = 1062 (0x426), region = 48  ;;  %s3990_s16 = sshll.u32 (!%p5322_p0), %s4963_s3, 5 }
  0xce   : > { %s330_s21 = scalar_lea.sflag (!%p5322_p0), [#allocation6], %s4963_s3  ;;  %s333_s17 = scalar_lea.vmem (!%p5322_p0), [#allocation5], %s3990_s16 }
  0xd4   : > { %4596 = dma.done.wait (%p5323_p8), %s330_s21, 512  }
  0xd5   : > { %4598 = vsyncadd (%p5323_p8), %s330_s21, 4294966784  ;;  %s338_s0 = sand.u32 1, %s4723_s30   ;;  %s3991_s2 = sshll.u32 %s4963_s3, 3 }
  0xd6   : > { %s339_s8 = scalar_lea.sflag [#allocation9], %s338_s0  ;;  %s4973_s20 = scalar_lea.vmem [#allocation8], %s3991_s2 }
  0xd7   : > { %4600 = dma.done.wait (%p5323_p8), %s339_s8, 128  }
  0xd8   : > { %4602 = vsyncadd (%p5323_p8), %s339_s8, 4294967168  ;;  %p5324_p7 = scmp.eq.s32.totalorder %s4723_s30, 0 }
  0xda   : > { %4604 = dma.done.wait (%p5324_p7), [#allocation9], 1152   ;;  %p5325_p11 = pmov %p5324_p7 }
  0xdb   : > { %p5326_p4 = pmov %p5324_p7 }
  0xdc   : > { %4606 = vsyncadd (%p5325_p11), [#allocation9], 4294966144 }
  0xdd   : > { %4608 = dma.done.wait (%p5326_p4), [#allocation12], 1280   ;;  %p5327_p12 = pmov %p5326_p4 }
  0xde   : > { %p5328_p13 = pmov %p5326_p4 }
  0xdf   : > { %4610 = vsyncadd (%p5327_p12), [#allocation12], 4294966016 }
  0xe0   : > { %4612 = dma.done.wait (%p5328_p13), [#allocation15], 176   ;;  %p5329_p1 = pmov %p5326_p4 }
  0xe1   : > { %v4644_v0 = vmov 0.0   ;;  %v4993_v1 = vld [vmem:[%s333_s17 + $0x8] sm:$0xff]  ;;  %v4995_v2 = vld [vmem:[%s333_s17] sm:$0xff]  ;;  %v4997_v3 = vld [vmem:[%s333_s17 + $0x10] sm:$0xff]  ;;  %vm417_vm3 = vcmask 539648   ;;  %s4645_s9 = smov 111  }
  0xe2   : > { %4614 = vsyncadd (%p5329_p1), [#allocation15], 4294967120  ;;  %513 = vmatprep.mubr.f32.mxu0 %v4644_v0  ;;  %4077 = vmatprep.subr.mxu1 %v4644_v0  ;;  %vm403_vm0 = vcmp.ge.f32.partialorder %v4993_v1, 0.0  ;;  %v407_v4 = vmul.f32 0.2, %v4993_v1  ;;  %vm402_vm1 = vcmp.ge.f32.partialorder %v4995_v2, 0.0 }
  0xe3   : > { %v406_v5 = vmul.f32 0.2, %v4995_v2  ;;  %vm404_vm2 = vcmp.ge.f32.partialorder %v4997_v3, 0.0  ;;  %v408_v6 = vmul.f32 0.2, %v4997_v3  ;;  %v5005_v7 = vld [vmem:[%s333_s17 + $0x18] sm:$0xff] }
  0xe4   : > { %v411_v8 = vsel %vm403_vm0, %v4993_v1, %v407_v4  ;;  %vm405_vm4 = vcmp.ge.f32.partialorder %v5005_v7, 0.0  ;;  %v409_v10 = vmul.f32 0.2, %v5005_v7  ;;  %s4646_s14 = smov 110   ;;  %s4647_s18 = smov 109   ;;  %vm4649_vm5 = vmmov 0  }
  0xe5   : > { %v410_v9 = vsel %vm402_vm1, %v4995_v2, %v406_v5  ;;  %432 = vrot.lane.b32.xlu0 %v411_v8, %s4645_s9  ;;  %v412_v11 = vsel %vm404_vm2, %v4997_v3, %v408_v6  ;;  %s4648_s13 = smov 93   ;;  %4079 = vmatprep.mubr.msk.f32.mxu1 %vm4649_vm5, %v4644_v0  ;;  %s4650_s15 = smov 92   ;;  %v4654_v14 = vmov 0   ;;  %v2020_v15 = vld [vmem:[%s4973_s20] sm:$0xff]  ;;  %vm438_vm6 = vcmask 908288   ;;  %v421_v21 = vld [vmem:[#allocation10] sm:$0xff] }
  0xe6   : > { %430 = vrot.lane.b32.xlu1 %v410_v9, %s4645_s9  ;;  %v413_v12 = vsel %vm405_vm4, %v5005_v7, %v409_v10  ;;  %s4651_s10 = smov 91   ;;  %s4652_s29 = smov 75   ;;  %4350 = vset.pattern.permute.xlu0 %v4654_v14  ;;  %vm445_vm7 = vcmask 64512   ;;  %vm611_vm8 = vcmask 900096   ;;  %vm789_vm9 = vcmask 891904   ;;  %v594_v30 = vld [vmem:[#allocation10 + $0x8] sm:$0xff] }
  0xe7   : > { %418 = vst.msk [vmem:[#allocation2 + $0x18] sm:$0xff] %vm417_vm3, %v413_v12  ;;  %s4653_s12 = smov 74   ;;  %s4655_s19 = smov 73   ;;  %vm967_vm10 = vcmask 760832   ;;  %v772_v37 = vld [vmem:[#allocation10 + $0x10] sm:$0xff]  ;;  %vm1145_vm11 = vcmask 752640  }
  0xe8   : > { %v950_v45 = vld [vmem:[#allocation10 + $0x18] sm:$0xff]  ;;  %vm1323_vm12 = vcmask 744448   ;;  %v1128_v53 = vld [vmem:[#allocation10 + $0x20] sm:$0xff]  ;;  %vm1501_vm13 = vcmask 613376   ;;  %v1306_v62 = vld [vmem:[#allocation10 + $0x28] sm:$0xff]  ;;  %vm1679_vm14 = vcmask 605184  }
  0xe9   : > { %434 = vrot.lane.b32.xlu0 %v412_v11, %s4645_s9  ;;  %vm1857_vm15 = vcmask 596992   ;;  %s4656_s16 = smov 19   ;;  %s4657_s21 = smov 18   ;;  %vm2078_vm3 = vcmask 154624   ;;  %vm2250_vm4 = vcmask 146432  }
  0xea   : > { %605 = vrot.lane.b32.xlu1 %v411_v8, %s4646_s14  ;;  %s4658_s17 = smov 17   ;;  %s4659_s0 = smov 1  }
  0xeb   : > { %s4660_s2 = smov 127   ;;  %s4227_s8 = smul.u32 24, %s4963_s3 }
  0xec   : > { %s4228_s20 = smul.u32 384, %s4723_s30  ;;  %s3822_s30 = scalar_lea.sflag [#allocation7], %s4963_s3 }
  0xed   : > { %607 = vrot.lane.b32.xlu0 %v412_v11, %s4646_s14  ;;  %p5330_p2 = scmp.ne.s32.totalorder %s5317_s28, 0 }
  0xee   : > { %603 = vrot.lane.b32.xlu1 %v410_v9, %s4646_s14  ;;  %v425_v13 = vld [vmem:[#allocation2 + $0x18] sm:$0xff] }
  0xf1   : > { %783 = vrot.lane.b32.xlu0 %v411_v8, %s4647_s18 }
  0xf2   : > { %785 = vrot.lane.b32.xlu1 %v412_v11, %s4647_s18 }
  0xf5   : > { %781 = vrot.lane.b32.xlu0 %v410_v9, %s4647_s18 }
  0xf6   : > { %961 = vrot.lane.b32.xlu1 %v411_v8, %s4648_s13 }
  0xf9   : > { %963 = vrot.lane.b32.xlu0 %v412_v11, %s4648_s13 }
  0xfa   : > { %959 = vrot.lane.b32.xlu1 %v410_v9, %s4648_s13 }
  0xfd   : > { %1139 = vrot.lane.b32.xlu0 %v411_v8, %s4650_s15 }
  0xfe   : > { %1141 = vrot.lane.b32.xlu1 %v412_v11, %s4650_s15 }
 0x101   : > { %1137 = vrot.lane.b32.xlu0 %v410_v9, %s4650_s15 }
 0x102   : > { %436 = vrot.lane.b32.xlu1 %v425_v13, %s4645_s9 }
 0x105   : > { %609 = vrot.lane.b32.xlu0 %v425_v13, %s4646_s14 }
 0x106   : > { %1317 = vrot.lane.b32.xlu1 %v411_v8, %s4651_s10 }
 0x109   : > { %1319 = vrot.lane.b32.xlu0 %v412_v11, %s4651_s10 }
 0x10a   : > { %1315 = vrot.lane.b32.xlu1 %v410_v9, %s4651_s10 }
 0x10d   : > { %787 = vrot.lane.b32.xlu0 %v425_v13, %s4647_s18 }
 0x10e   : > { %965 = vrot.lane.b32.xlu1 %v425_v13, %s4648_s13 }
 0x111   : > { %1495 = vrot.lane.b32.xlu0 %v411_v8, %s4652_s29 }
 0x112   : > { %1497 = vrot.lane.b32.xlu1 %v412_v11, %s4652_s29 }
 0x115   : > { %1493 = vrot.lane.b32.xlu0 %v410_v9, %s4652_s29 }
 0x116   : > { %1143 = vrot.lane.b32.xlu1 %v425_v13, %s4650_s15 }
 0x119   : > { %1321 = vrot.lane.b32.xlu0 %v425_v13, %s4651_s10 }
 0x11a   : > { %1673 = vrot.lane.b32.xlu1 %v411_v8, %s4653_s12 }
 0x11d   : > { %1675 = vrot.lane.b32.xlu0 %v412_v11, %s4653_s12 }
 0x11e   : > { %1671 = vrot.lane.b32.xlu1 %v410_v9, %s4653_s12 }
 0x121   : > { %1499 = vrot.lane.b32.xlu0 %v425_v13, %s4652_s29  ;;  %s4661_s29 = smov [#allocation17]  }
 0x122   : > { %1677 = vrot.lane.b32.xlu1 %v425_v13, %s4653_s12  ;;  %s4555_s12 = sshll.u32 %s4661_s29, 4  ;;  %s4556_s12 = int_to_ptr.vmem [resolvable:$false] %s4555_s12 }
 0x125   : > { %1851 = vrot.lane.b32.xlu0 %v411_v8, %s4655_s19 }
 0x126   : > { %1853 = vrot.lane.b32.xlu1 %v412_v11, %s4655_s19  ;;  %v1484_v11 = vld [vmem:[#allocation10 + $0x30] sm:$0xff] }
 0x129   : > { %1849 = vrot.lane.b32.xlu0 %v410_v9, %s4655_s19 }
 0x12a   : > { %1855 = vrot.lane.b32.xlu1 %v425_v13, %s4655_s19  ;;  %s4557_s19 = scalar_lea.vmem %s4556_s12, 768 }
 0x12d   : > { %2023 = vperm.xlu0 %4350, %v2020_v15  }
 0x131   : > { %2070 = vrot.lane.b32.xlu0 %v4644_v0, %s4656_s16 }
 0x157   : > { %v433_v16 = vpop.permute.xlu0 %432 }
 0x158   : > { %v431_v17 = vpop.permute.xlu1 %430 }
 0x159   : > { %v439_v22 = vsel %vm438_vm6, %v431_v17, %v433_v16 }
 0x15b   : > { %v435_v18 = vpop.permute.xlu0 %434 }
 0x15c   : > { %v606_v19 = vpop.permute.xlu1 %605  ;;  %v440_v20 = vsel %vm438_vm6, %v433_v16, %v435_v18 }
 0x15d   : > { %449 = vmatprep.subr.mxu0 %v440_v20 }
 0x15e   : > { %450 = vmatpush1.msra.mxu0 %v439_v22 }
 0x15f   : > { %v608_v23 = vpop.permute.xlu0 %607  ;;  %3997 = vmatmul.mubr.msk.f32.vlgmr.msra.gmra.mrb[0].mxu0 %vm445_vm7, %v421_v21 }
 0x160   : > { %v604_v24 = vpop.permute.xlu1 %603  ;;  %v613_v26 = vsel %vm611_vm8, %v606_v19, %v608_v23  ;;  %685 = vmatprep.mubr.f32.mxu0 %v4644_v0 }
 0x161   : > { %v612_v25 = vsel %vm611_vm8, %v604_v24, %v606_v19  ;;  %621 = vmatprep.subr.mxu0 %v613_v26  ;;  %v1662_v19 = vld [vmem:[#allocation10 + $0x38] sm:$0xff]  ;;  %v1840_v26 = vld [vmem:[#allocation10 + $0x40] sm:$0xff] }
 0x162   : > { %622 = vmatpush1.msra.mxu0 %v612_v25 }
 0x163   : > { %v784_v27 = vpop.permute.xlu0 %783 }
 0x164   : > { %v786_v28 = vpop.permute.xlu1 %785 }
 0x165   : > { %v791_v29 = vsel %vm789_vm9, %v784_v27, %v786_v28 }
 0x166   : > { %799 = vmatprep.subr.mxu0 %v791_v29 }
 0x167   : > { %v782_v31 = vpop.permute.xlu0 %781  ;;  %3999 = vmatmul.mubr.msk.f32.vlgmr.msra.gmra.mrb[0].mxu0 %vm445_vm7, %v594_v30 }
 0x168   : > { %v962_v32 = vpop.permute.xlu1 %961  ;;  %v790_v33 = vsel %vm789_vm9, %v782_v31, %v784_v27  ;;  %863 = vmatprep.mubr.f32.mxu0 %v4644_v0 }
 0x169   : > { %800 = vmatpush1.msra.mxu0 %v790_v33 }
 0x16b   : > { %v964_v34 = vpop.permute.xlu0 %963 }
 0x16c   : > { %v960_v35 = vpop.permute.xlu1 %959  ;;  %v969_v36 = vsel %vm967_vm10, %v962_v32, %v964_v34 }
 0x16d   : > { %977 = vmatprep.subr.mxu0 %v969_v36  ;;  %v968_v38 = vsel %vm967_vm10, %v960_v35, %v962_v32 }
 0x16f   : > { %v1140_v39 = vpop.permute.xlu0 %1139  ;;  %4001 = vmatmul.mubr.msk.f32.vlgmr.msra.gmra.mrb[0].mxu0 %vm445_vm7, %v772_v37 }
 0x170   : > { %v1142_v40 = vpop.permute.xlu1 %1141  ;;  %978 = vmatpush1.msra.mxu0 %v968_v38  ;;  %1041 = vmatprep.mubr.f32.mxu0 %v4644_v0 }
 0x171   : > { %v1147_v41 = vsel %vm1145_vm11, %v1140_v39, %v1142_v40 }
 0x172   : > { %1155 = vmatprep.subr.mxu0 %v1147_v41 }
 0x173   : > { %v1138_v42 = vpop.permute.xlu0 %1137 }
 0x174   : > { %v437_v43 = vpop.permute.xlu1 %436  ;;  %v1146_v46 = vsel %vm1145_vm11, %v1138_v42, %v1140_v39 }
 0x175   : > { %v441_v44 = vsel %vm438_vm6, %v435_v18, %v437_v43 }
 0x176   : > { %4078 = vmatpush3.msra.mxu1 %v441_v44 }
 0x177   : > { %4082 = vmatprep.subr.mxu1 %v4644_v0  ;;  %4080 = vmatmul.mubr.msk.f32.vlgmr.msra.gmra.mrb[0].mxu1 %vm445_vm7, %v421_v21  ;;  %v610_v47 = vpop.permute.xlu0 %609 }
 0x178   : > { %4003 = vmatmul.mubr.msk.f32.vlgmr.msra.gmra.mrb[0].mxu0 %vm445_vm7, %v950_v45  ;;  %v1318_v48 = vpop.permute.xlu1 %1317  ;;  %4084 = vmatprep.mubr.msk.f32.mxu1 %vm4649_vm5, %v4644_v0  ;;  %v614_v49 = vsel %vm611_vm8, %v608_v23, %v610_v47 }
 0x179   : > { %1156 = vmatpush1.msra.mxu0 %v1146_v46  ;;  %1219 = vmatprep.mubr.f32.mxu0 %v4644_v0  ;;  %v2040_v46 = vlaneseq }
 0x17a   : > { %4083 = vmatpush3.msra.mxu1 %v614_v49 }
 0x17b   : > { %4085 = vmatmul.mubr.msk.f32.vlgmr.msra.gmra.mrb[2].mxu1 %vm445_vm7, %v594_v30  ;;  %4087 = vmatprep.subr.mxu1 %v4644_v0  ;;  %v1320_v50 = vpop.permute.xlu0 %1319 }
 0x17c   : > { %v1316_v51 = vpop.permute.xlu1 %1315  ;;  %4089 = vmatprep.mubr.msk.f32.mxu1 %vm4649_vm5, %v4644_v0  ;;  %v1325_v52 = vsel %vm1323_vm12, %v1318_v48, %v1320_v50 }
 0x17d   : > { %1333 = vmatprep.subr.mxu0 %v1325_v52  ;;  %v1324_v54 = vsel %vm1323_vm12, %v1316_v51, %v1318_v48 }
 0x17f   : > { %v788_v55 = vpop.permute.xlu0 %787 }
 0x180   : > { %4005 = vmatmul.mubr.msk.f32.vlgmr.msra.gmra.mrb[0].mxu0 %vm445_vm7, %v1128_v53  ;;  %v966_v56 = vpop.permute.xlu1 %965  ;;  %v792_v57 = vsel %vm789_vm9, %v786_v28, %v788_v55 }
 0x181   : > { %1334 = vmatpush1.msra.mxu0 %v1324_v54  ;;  %1397 = vmatprep.mubr.f32.mxu0 %v4644_v0  ;;  %v970_v58 = vsel %vm967_vm10, %v964_v34, %v966_v56  ;;  %vm2428_vm10 = vcmask 138240  }
 0x182   : > { %4088 = vmatpush3.msra.mxu1 %v792_v57  ;;  %v2038_v57 = vld [vmem:[#allocation16] sm:$0x7] }
 0x183   : > { %4090 = vmatmul.mubr.msk.f32.vlgmr.msra.gmra.mrb[4].mxu1 %vm445_vm7, %v772_v37  ;;  %4092 = vmatprep.subr.mxu1 %v4644_v0  ;;  %v1496_v59 = vpop.permute.xlu0 %1495 }
 0x184   : > { %4093 = vmatpush3.msra.mxu1 %v970_v58  ;;  %v1498_v60 = vpop.permute.xlu1 %1497  ;;  %4094 = vmatprep.mubr.msk.f32.mxu1 %vm4649_vm5, %v4644_v0 }
 0x185   : > { %v1503_v61 = vsel %vm1501_vm13, %v1496_v59, %v1498_v60  ;;  %4097 = vmatprep.subr.mxu1 %v4644_v0 }
 0x186   : > { %1511 = vmatprep.subr.mxu0 %v1503_v61 }
 0x187   : > { %4095 = vmatmul.mubr.msk.f32.vlgmr.msra.gmra.mrb[6].mxu1 %vm445_vm7, %v950_v45  ;;  %v1494_v63 = vpop.permute.xlu0 %1493 }
 0x188   : > { %4007 = vmatmul.mubr.msk.f32.vlgmr.msra.gmra.mrb[0].mxu0 %vm445_vm7, %v1306_v62  ;;  %v1144_v4 = vpop.permute.xlu1 %1143  ;;  %4099 = vmatprep.mubr.msk.f32.mxu1 %vm4649_vm5, %v4644_v0  ;;  %v1502_v5 = vsel %vm1501_vm13, %v1494_v63, %v1496_v59 }
 0x189   : > { %v1148_v6 = vsel %vm1145_vm11, %v1142_v40, %v1144_v4  ;;  %1575 = vmatprep.mubr.f32.mxu0 %v4644_v0  ;;  %1512 = vmatpush1.msra.mxu0 %v1502_v5 }
 0x18a   : > { %4098 = vmatpush3.msra.mxu1 %v1148_v6 }
 0x18b   : > { %4100 = vmatmul.mubr.msk.f32.vlgmr.msra.gmra.mrb[8].mxu1 %vm445_vm7, %v1128_v53  ;;  %4102 = vmatprep.subr.mxu1 %v4644_v0  ;;  %v1322_v8 = vpop.permute.xlu0 %1321 }
 0x18c   : > { %v1674_v9 = vpop.permute.xlu1 %1673  ;;  %4104 = vmatprep.mubr.msk.f32.mxu1 %vm4649_vm5, %v4644_v0  ;;  %v1326_v10 = vsel %vm1323_vm12, %v1320_v50, %v1322_v8  ;;  %v2041_v50 = vshrl.u32 %v2040_v46, 7  ;;  %vm2606_vm12 = vcmask 7168  }
 0x18d   : > { %4103 = vmatpush3.msra.mxu1 %v1326_v10 }
 0x18e   : > { %4107 = vmatprep.subr.mxu1 %v4644_v0  ;;  %v2042_v55 = vsub.s32 0, %v2041_v50  ;;  %v2046_v5 = vsub.s32 1, %v2041_v50 }
 0x18f   : > { %4105 = vmatmul.mubr.msk.f32.vlgmr.msra.gmra.mrb[10].mxu1 %vm445_vm7, %v1306_v62  ;;  %v1676_v12 = vpop.permute.xlu0 %1675 }
 0x190   : > { %4009 = vmatmul.mubr.msk.f32.vlgmr.msra.gmra.mrb[0].mxu0 %vm445_vm7, %v1484_v11  ;;  %v1672_v13 = vpop.permute.xlu1 %1671  ;;  %4109 = vmatprep.mubr.msk.f32.mxu1 %vm4649_vm5, %v4644_v0  ;;  %v1681_v15 = vsel %vm1679_vm14, %v1674_v9, %v1676_v12  ;;  %v2043_v63 = vrot.slane %v2038_v57, %v2042_v55  ;;  %v2767_v55 = vld [vmem:[#allocation11 + $0x20] sm:$0xff] }
 0x191   : > { %v1680_v14 = vsel %vm1679_vm14, %v1672_v13, %v1674_v9  ;;  %1753 = vmatprep.mubr.f32.mxu0 %v4644_v0  ;;  %1689 = vmatprep.subr.mxu0 %v1681_v15  ;;  %v2047_v13 = vrot.slane %v2038_v57, %v2046_v5 }
 0x192   : > { %1690 = vmatpush1.msra.mxu0 %v1680_v14 }
 0x193   : > { %v1500_v16 = vpop.permute.xlu0 %1499 }
 0x194   : > { %v1678_v17 = vpop.permute.xlu1 %1677  ;;  %v1504_v18 = vsel %vm1501_vm13, %v1498_v60, %v1500_v16  ;;  %vm2942_vm13 = vcmask 1039360  }
 0x195   : > { %4108 = vmatpush3.msra.mxu1 %v1504_v18  ;;  %v1682_v20 = vsel %vm1679_vm14, %v1676_v12, %v1678_v17 }
 0x196   : > { %4110 = vmatmul.mubr.msk.f32.vlgmr.msra.gmra.mrb[12].mxu1 %vm445_vm7, %v1484_v11  ;;  %4112 = vmatprep.subr.mxu1 %v4644_v0  ;;  %v2050_v11 = vsub.s32 2, %v2041_v50 }
 0x197   : > { %v1852_v21 = vpop.permute.xlu0 %1851  ;;  %4113 = vmatpush3.msra.mxu1 %v1682_v20  ;;  %4114 = vmatprep.mubr.msk.f32.mxu1 %vm4649_vm5, %v4644_v0  ;;  %v3803_v20 = vld [vmem:[#allocation13] sm:$0xff] }
 0x198   : > { %4011 = vmatmul.mubr.msk.f32.vlgmr.msra.gmra.mrb[0].mxu0 %vm445_vm7, %v1662_v19  ;;  %v1854_v22 = vpop.permute.xlu1 %1853  ;;  %4117 = vmatprep.subr.mxu1 %v4644_v0  ;;  %v2051_v16 = vrot.slane %v2038_v57, %v2050_v11  ;;  %v3103_v11 = vld [vmem:[#allocation11 + $0x30] sm:$0xff] }
 0x199   : > { %v1859_v23 = vsel %vm1857_vm15, %v1852_v21, %v1854_v22  ;;  %1931 = vmatprep.mubr.f32.mxu0 %v4644_v0 }
 0x19a   : > { %1867 = vmatprep.subr.mxu0 %v1859_v23  ;;  %4115 = vmatmul.mubr.msk.f32.vlgmr.msra.gmra.mrb[14].mxu1 %vm445_vm7, %v1662_v19 }
 0x19b   : > { %v1850_v24 = vpop.permute.xlu0 %1849  ;;  %4119 = vmatprep.mubr.msk.f32.mxu1 %vm4649_vm5, %v4644_v0 }
 0x19c   : > { %v1856_v25 = vpop.permute.xlu1 %1855  ;;  %v1858_v27 = vsel %vm1857_vm15, %v1850_v24, %v1852_v21 }
 0x19d   : > { %v1860_v28 = vsel %vm1857_vm15, %v1854_v22, %v1856_v25  ;;  %1868 = vmatpush1.msra.mxu0 %v1858_v27  ;;  %v2061_v25 = vld [vmem:[#allocation11] sm:$0xff] }
 0x19e   : > { %4118 = vmatpush3.msra.mxu1 %v1860_v28 }
 0x19f   : > { %4120 = vmatmul.mubr.msk.f32.vlgmr.msra.gmra.mrb[16].mxu1 %vm445_vm7, %v1840_v26  ;;  %4122 = vmatprep.subr.mxu1 %v4644_v0 }
 0x1a0   : > { %4013 = vmatmul.mubr.msk.f32.vlgmr.msra.gmra.mrb[0].mxu0 %vm445_vm7, %v1840_v26  ;;  %4124 = vmatprep.mubr.msk.f32.mxu1 %vm4649_vm5, %v4644_v0 }
 0x1a1   : > { %2152 = vmatprep.mubr.f32.mxu0 %v4644_v0 }
 0x1ac   : > { %v2024_v54 = vpop.permute.xlu0 %2023 }
 0x24a   : > { %v586_v29 = vpop.f32.mrb[0].mxu1 }
 0x24b   : > { %v4081_v30 = vpop.f32.mrb[1].mxu1 }
 0x24e   : > { %v758_v31 = vpop.f32.mrb[2].mxu1 }
 0x24f   : > { %v767_v32 = vadd.f32 %v758_v31, %v586_v29  ;;  %v4086_v33 = vpop.f32.mrb[3].mxu1  ;;  %v2233_v31 = vld [vmem:[#allocation11 + $0x8] sm:$0xff] }
 0x256   : > { %v936_v34 = vpop.f32.mrb[4].mxu1 }
 0x257   : > { %v945_v35 = vadd.f32 %v936_v34, %v767_v32  ;;  %v4091_v36 = vpop.f32.mrb[5].mxu1 }
 0x25a   : > { %v1114_v37 = vpop.f32.mrb[6].mxu1 }
 0x25b   : > { %v1123_v38 = vadd.f32 %v1114_v37, %v945_v35  ;;  %v4096_v39 = vpop.f32.mrb[7].mxu1 }
 0x25c   : > { %v2411_v39 = vld [vmem:[#allocation11 + $0x10] sm:$0xff] }
 0x25e   : > { %v1292_v40 = vpop.f32.mrb[8].mxu1 }
 0x25f   : > { %v1301_v41 = vadd.f32 %v1292_v40, %v1123_v38  ;;  %v4101_v42 = vpop.f32.mrb[9].mxu1 }
 0x262   : > { %v1470_v43 = vpop.f32.mrb[10].mxu1 }
 0x263   : > { %v1479_v44 = vadd.f32 %v1470_v43, %v1301_v41  ;;  %v4106_v45 = vpop.f32.mrb[11].mxu1 }
 0x269   : > { %v1648_v47 = vpop.f32.mrb[12].mxu1 }
 0x26a   : > { %v1657_v48 = vadd.f32 %v1648_v47, %v1479_v44  ;;  %v4111_v49 = vpop.f32.mrb[13].mxu1  ;;  %v2589_v47 = vld [vmem:[#allocation11 + $0x18] sm:$0xff] }
 0x26d   : > { %v1826_v51 = vpop.f32.mrb[14].mxu1 }
 0x26e   : > { %v1835_v52 = vadd.f32 %v1826_v51, %v1657_v48  ;;  %v4116_v53 = vpop.f32.mrb[15].mxu1 }
 0x272   : > { %v2004_v56 = vpop.f32.mrb[16].mxu1 }
 0x273   : > { %v2013_v58 = vadd.f32 %v2004_v56, %v1835_v52  ;;  %v1933_v59 = vpop.f32.mrb[0].mxu0  ;;  %v4121_v60 = vpop.f32.mrb[17].mxu1 }
 0x274   : > { %v2026_v61 = vadd.f32 %v2024_v54, %v1933_v59  ;;  %v1935_v62 = vpop.f32.mrb[1].mxu0 }
 0x275   : > { %v2027_v4 = vadd.f32 %v2024_v54, %v1935_v62  ;;  %v2028_v6 = vadd.f32 %v2024_v54, %v2013_v58  ;;  %v2925_v62 = vld [vmem:[#allocation11 + $0x28] sm:$0xff] }
 0x276   : > { %vm2029_vm0 = vcmp.ge.f32.partialorder %v2026_v61, 0.0  ;;  %v2032_v8 = vmul.f32 0.2, %v2026_v61 }
 0x277   : > { %vm2030_vm1 = vcmp.ge.f32.partialorder %v2027_v4, 0.0  ;;  %v2033_v9 = vmul.f32 0.2, %v2027_v4  ;;  %v2034_v14 = vmul.f32 0.2, %v2028_v6  ;;  %vm2031_vm2 = vcmp.ge.f32.partialorder %v2028_v6, 0.0 }
 0x278   : > { %v2035_v10 = vsel %vm2029_vm0, %v2026_v61, %v2032_v8 }
 0x279   : > { %v5115_v12 = vmul.f32 %v2043_v63, %v2035_v10  ;;  %v2036_v15 = vsel %vm2030_vm1, %v2027_v4, %v2033_v9  ;;  %v2037_v18 = vsel %vm2031_vm2, %v2028_v6, %v2034_v14 }
 0x27a   : > { %v5120_v17 = vmul.f32 %v2047_v13, %v2036_v15  ;;  %v5125_v19 = vmul.f32 %v2051_v16, %v2037_v18  ;;  %v3280_v18 = vld [vmem:[#allocation11 + $0x38] sm:$0xff] }
 0x27b   : > { %2244 = vrot.lane.b32.xlu0 %v5115_v12, %s4657_s21  ;;  %2072 = vrot.lane.b32.xlu1 %v5115_v12, %s4656_s16 }
 0x27f   : > { %2242 = vrot.lane.b32.xlu0 %v4644_v0, %s4657_s21  ;;  %2074 = vrot.lane.b32.xlu1 %v5120_v17, %s4656_s16 }
 0x283   : > { %2422 = vrot.lane.b32.xlu0 %v5115_v12, %s4658_s17  ;;  %2076 = vrot.lane.b32.xlu1 %v5125_v19, %s4656_s16 }
 0x287   : > { %2420 = vrot.lane.b32.xlu0 %v4644_v0, %s4658_s17  ;;  %2246 = vrot.lane.b32.xlu1 %v5120_v17, %s4657_s21 }
 0x28b   : > { %2600 = vrot.lane.b32.xlu0 %v5115_v12, %s4659_s0  ;;  %2248 = vrot.lane.b32.xlu1 %v5125_v19, %s4657_s21 }
 0x28f   : > { %2598 = vrot.lane.b32.xlu0 %v4644_v0, %s4659_s0  ;;  %2424 = vrot.lane.b32.xlu1 %v5120_v17, %s4658_s17 }
 0x293   : > { %2936 = vrot.lane.b32.xlu0 %v5120_v17, %s4660_s2  ;;  %2426 = vrot.lane.b32.xlu1 %v5125_v19, %s4658_s17 }
 0x297   : > { %2934 = vrot.lane.b32.xlu0 %v5115_v12, %s4660_s2  ;;  %2602 = vrot.lane.b32.xlu1 %v5120_v17, %s4659_s0 }
 0x29b   : > { %3114 = vrot.lane.b32.xlu0 %v5120_v17, %s4645_s9  ;;  %2604 = vrot.lane.b32.xlu1 %v5125_v19, %s4659_s0 }
 0x29f   : > { %3112 = vrot.lane.b32.xlu0 %v5115_v12, %s4645_s9  ;;  %2938 = vrot.lane.b32.xlu1 %v5125_v19, %s4660_s2 }
 0x2a3   : > { %3291 = vrot.lane.b32.xlu0 %v5120_v17, %s4646_s14  ;;  %2940 = vrot.lane.b32.xlu1 %v4644_v0, %s4660_s2 }
 0x2a7   : > { %3289 = vrot.lane.b32.xlu0 %v5115_v12, %s4646_s14  ;;  %3116 = vrot.lane.b32.xlu1 %v5125_v19, %s4645_s9 }
 0x2ab   : > { %3468 = vrot.lane.b32.xlu0 %v5120_v17, %s4647_s18  ;;  %3118 = vrot.lane.b32.xlu1 %v4644_v0, %s4645_s9  ;;  %s397_s9 = scalar_lea.vmem [#allocation17], %s4227_s8 }
 0x2af   : > { %3466 = vrot.lane.b32.xlu0 %v5115_v12, %s4647_s18  ;;  %3293 = vrot.lane.b32.xlu1 %v5125_v19, %s4646_s14 }
 0x2b3   : > { %3644 = vrot.lane.b32.xlu0 %v4993_v1, %s4650_s15  ;;  %3295 = vrot.lane.b32.xlu1 %v4644_v0, %s4646_s14  ;;  %v2071_v1 = vpop.permute.xlu0 %2070  ;;  %s3836_s14 = sshll.u32 %s397_s9, 4  ;;  %s5253_s14 = int_to_ptr.vmem [resolvable:$true] %s3836_s14 }
 0x2b4   : > { %s4551_s10 = scalar_lea.vmem %s5253_s14, 384  ;;  %p4558_p5 = scmp.lt.s32.totalorder %s5253_s14, %s4556_s12 }
 0x2b5   : > { %p4552_p3 = scmp.ne.s32.totalorder %s5253_s14, %s4551_s10  ;;  %p4559_p9 = scmp.lt.s32.totalorder %s4557_s19, %s4551_s10 }
 0x2b7   : > { %3642 = vrot.lane.b32.xlu0 %v4995_v2, %s4650_s15  ;;  %3470 = vrot.lane.b32.xlu1 %v5125_v19, %s4647_s18  ;;  %p4553_p6 = pnand %p4552_p3, %p5330_p2  ;;  %p4560_p0 = por %p4559_p9, %p4558_p5 }
 0x2b9   : > { %p4554_p10 = pneg %p4553_p6 }
 0x2bb   : > { %3806 = vperm.xlu0 %4350, %v3803_v20   ;;  %3472 = vrot.lane.b32.xlu1 %v4644_v0, %s4647_s18  ;;  %p4561_p8 = pnand %p4560_p0, %p4554_p10 }
 0x2bf   : > { %3646 = vrot.lane.b32.xlu1 %v4997_v3, %s4650_s15 }
 0x2c3   : > { %3648 = vrot.lane.b32.xlu1 %v5005_v7, %s4650_s15  ;;  %s5251_s15 = scalar_lea.hbm %s5302_s7, %s4228_s20 }
 0x2ed   : > { %v2245_v21 = vpop.permute.xlu0 %2244  ;;  %v2073_v22 = vpop.permute.xlu1 %2072 }
 0x2ee   : > { %v2079_v26 = vsel %vm2078_vm3, %v2071_v1, %v2073_v22 }
 0x2f1   : > { %v2243_v23 = vpop.permute.xlu0 %2242  ;;  %v2075_v2 = vpop.permute.xlu1 %2074 }
 0x2f2   : > { %v2080_v24 = vsel %vm2078_vm3, %v2073_v22, %v2075_v2  ;;  %v2251_v32 = vsel %vm2250_vm4, %v2243_v23, %v2245_v21  ;;  %v3457_v23 = vld [vmem:[#allocation11 + $0x40] sm:$0xff] }
 0x2f3   : > { %2088 = vmatprep.subr.mxu0 %v2080_v24 }
 0x2f4   : > { %2089 = vmatpush1.msra.mxu0 %v2079_v26 }
 0x2f5   : > { %v2423_v27 = vpop.permute.xlu0 %2422  ;;  %4015 = vmatmul.mubr.msk.f32.vlgmr.msra.gmra.mrb[2].mxu0 %vm445_vm7, %v2061_v25  ;;  %v2077_v28 = vpop.permute.xlu1 %2076 }
 0x2f6   : > { %v2081_v29 = vsel %vm2078_vm3, %v2075_v2, %v2077_v28  ;;  %2324 = vmatprep.mubr.f32.mxu0 %v4644_v0  ;;  %v3633_v28 = vld [vmem:[#allocation14] sm:$0xff] }
 0x2f7   : > { %4123 = vmatpush3.msra.mxu1 %v2081_v29 }
 0x2f8   : > { %4125 = vmatmul.mubr.msk.f32.vlgmr.msra.gmra.mrb[18].mxu1 %vm445_vm7, %v2061_v25  ;;  %4127 = vmatprep.subr.mxu1 %v4644_v0 }
 0x2f9   : > { %v2421_v3 = vpop.permute.xlu0 %2420  ;;  %v2247_v7 = vpop.permute.xlu1 %2246  ;;  %4129 = vmatprep.mubr.msk.f32.mxu1 %vm4649_vm5, %v4644_v0 }
 0x2fa   : > { %v2252_v30 = vsel %vm2250_vm4, %v2245_v21, %v2247_v7  ;;  %v2429_v40 = vsel %vm2428_vm10, %v2421_v3, %v2423_v27 }
 0x2fb   : > { %2260 = vmatprep.subr.mxu0 %v2252_v30 }
 0x2fc   : > { %2261 = vmatpush1.msra.mxu0 %v2251_v32 }
 0x2fd   : > { %v2601_v33 = vpop.permute.xlu0 %2600  ;;  %4017 = vmatmul.mubr.msk.f32.vlgmr.msra.gmra.mrb[2].mxu0 %vm445_vm7, %v2233_v31  ;;  %v2249_v34 = vpop.permute.xlu1 %2248 }
 0x2fe   : > { %v2253_v35 = vsel %vm2250_vm4, %v2247_v7, %v2249_v34  ;;  %2502 = vmatprep.mubr.f32.mxu0 %v4644_v0 }
 0x2ff   : > { %4128 = vmatpush3.msra.mxu1 %v2253_v35 }
 0x300   : > { %4130 = vmatmul.mubr.msk.f32.vlgmr.msra.gmra.mrb[18].mxu1 %vm445_vm7, %v2233_v31  ;;  %4132 = vmatprep.subr.mxu1 %v4644_v0 }
 0x301   : > { %v2599_v36 = vpop.permute.xlu0 %2598  ;;  %v2425_v37 = vpop.permute.xlu1 %2424  ;;  %4134 = vmatprep.mubr.msk.f32.mxu1 %vm4649_vm5, %v4644_v0 }
 0x302   : > { %v2430_v38 = vsel %vm2428_vm10, %v2423_v27, %v2425_v37  ;;  %v2607_v48 = vsel %vm2606_vm12, %v2599_v36, %v2601_v33 }
 0x303   : > { %2438 = vmatprep.subr.mxu0 %v2430_v38 }
 0x304   : > { %2439 = vmatpush1.msra.mxu0 %v2429_v40 }
 0x305   : > { %v2937_v41 = vpop.permute.xlu0 %2936  ;;  %4019 = vmatmul.mubr.msk.f32.vlgmr.msra.gmra.mrb[2].mxu0 %vm445_vm7, %v2411_v39  ;;  %v2427_v42 = vpop.permute.xlu1 %2426 }
 0x306   : > { %v2431_v43 = vsel %vm2428_vm10, %v2425_v37, %v2427_v42  ;;  %2680 = vmatprep.mubr.f32.mxu0 %v4644_v0 }
 0x307   : > { %4133 = vmatpush3.msra.mxu1 %v2431_v43 }
 0x308   : > { %4135 = vmatmul.mubr.msk.f32.vlgmr.msra.gmra.mrb[18].mxu1 %vm445_vm7, %v2411_v39  ;;  %4137 = vmatprep.subr.mxu1 %v4644_v0 }
 0x309   : > { %v2935_v44 = vpop.permute.xlu0 %2934  ;;  %v2603_v45 = vpop.permute.xlu1 %2602  ;;  %4139 = vmatprep.mubr.msk.f32.mxu1 %vm4649_vm5, %v4644_v0 }
 0x30a   : > { %v2608_v46 = vsel %vm2606_vm12, %v2601_v33, %v2603_v45  ;;  %v2943_v56 = vsel %vm2942_vm13, %v2935_v44, %v2937_v41 }
 0x30b   : > { %2616 = vmatprep.subr.mxu0 %v2608_v46 }
 0x30c   : > { %2617 = vmatpush1.msra.mxu0 %v2607_v48 }
 0x30d   : > { %v3115_v49 = vpop.permute.xlu0 %3114  ;;  %4021 = vmatmul.mubr.msk.f32.vlgmr.msra.gmra.mrb[2].mxu0 %vm445_vm7, %v2589_v47  ;;  %2774 = vmatprep.subr.mxu0 %v5120_v17  ;;  %v2605_v50 = vpop.permute.xlu1 %2604 }
 0x30e   : > { %v2609_v51 = vsel %vm2606_vm12, %v2603_v45, %v2605_v50  ;;  %2775 = vmatpush1.msra.mxu0 %v5115_v12  ;;  %2838 = vmatprep.mubr.f32.mxu0 %v4644_v0 }
 0x30f   : > { %4138 = vmatpush3.msra.mxu1 %v2609_v51 }
 0x310   : > { %4140 = vmatmul.mubr.msk.f32.vlgmr.msra.gmra.mrb[18].mxu1 %vm445_vm7, %v2589_v47  ;;  %4142 = vmatprep.subr.mxu1 %v4644_v0 }
 0x311   : > { %v3113_v52 = vpop.permute.xlu0 %3112  ;;  %4143 = vmatpush3.msra.mxu1 %v5125_v19  ;;  %v2939_v53 = vpop.permute.xlu1 %2938  ;;  %4144 = vmatprep.mubr.msk.f32.mxu1 %vm4649_vm5, %v4644_v0 }
 0x312   : > { %v2944_v54 = vsel %vm2942_vm13, %v2937_v41, %v2939_v53  ;;  %4147 = vmatprep.subr.mxu1 %v4644_v0  ;;  %v3120_v4 = vsel %vm438_vm6, %v3113_v52, %v3115_v49 }
 0x313   : > { %2952 = vmatprep.subr.mxu0 %v2944_v54 }
 0x315   : > { %4023 = vmatmul.mubr.msk.f32.vlgmr.msra.gmra.mrb[2].mxu0 %vm445_vm7, %v2767_v55  ;;  %v2941_v57 = vpop.permute.xlu1 %2940  ;;  %v3292_v58 = vpop.permute.xlu0 %3291 }
 0x316   : > { %2953 = vmatpush1.msra.mxu0 %v2943_v56  ;;  %v2945_v59 = vsel %vm2942_vm13, %v2939_v53, %v2941_v57  ;;  %3016 = vmatprep.mubr.f32.mxu0 %v4644_v0 }
 0x318   : > { %4145 = vmatmul.mubr.msk.f32.vlgmr.msra.gmra.mrb[18].mxu1 %vm445_vm7, %v2767_v55 }
 0x319   : > { %4148 = vmatpush3.msra.mxu1 %v2945_v59  ;;  %v3117_v60 = vpop.permute.xlu1 %3116  ;;  %4149 = vmatprep.mubr.msk.f32.mxu1 %vm4649_vm5, %v4644_v0  ;;  %v3290_v63 = vpop.permute.xlu0 %3289 }
 0x31a   : > { %v3121_v61 = vsel %vm438_vm6, %v3115_v49, %v3117_v60  ;;  %4152 = vmatprep.subr.mxu1 %v4644_v0  ;;  %v3297_v12 = vsel %vm611_vm8, %v3290_v63, %v3292_v58 }
 0x31b   : > { %3129 = vmatprep.subr.mxu0 %v3121_v61 }
 0x31d   : > { %4025 = vmatmul.mubr.msk.f32.vlgmr.msra.gmra.mrb[2].mxu0 %vm445_vm7, %v2925_v62  ;;  %v3119_v5 = vpop.permute.xlu1 %3118  ;;  %v3469_v9 = vpop.permute.xlu0 %3468 }
 0x31e   : > { %3130 = vmatpush1.msra.mxu0 %v3120_v4  ;;  %v3122_v6 = vsel %vm438_vm6, %v3117_v60, %v3119_v5  ;;  %3193 = vmatprep.mubr.f32.mxu0 %v4644_v0 }
 0x320   : > { %4150 = vmatmul.mubr.msk.f32.vlgmr.msra.gmra.mrb[18].mxu1 %vm445_vm7, %v2925_v62 }
 0x321   : > { %4153 = vmatpush3.msra.mxu1 %v3122_v6  ;;  %v3294_v8 = vpop.permute.xlu1 %3293  ;;  %4154 = vmatprep.mubr.msk.f32.mxu1 %vm4649_vm5, %v4644_v0  ;;  %v3467_v15 = vpop.permute.xlu0 %3466 }
 0x322   : > { %v3298_v10 = vsel %vm611_vm8, %v3292_v58, %v3294_v8  ;;  %4157 = vmatprep.subr.mxu1 %v4644_v0  ;;  %v3474_v20 = vsel %vm789_vm9, %v3467_v15, %v3469_v9 }
 0x323   : > { %3306 = vmatprep.subr.mxu0 %v3298_v10 }
 0x325   : > { %4027 = vmatmul.mubr.msk.f32.vlgmr.msra.gmra.mrb[2].mxu0 %vm445_vm7, %v3103_v11  ;;  %v3296_v13 = vpop.permute.xlu1 %3295  ;;  %v3645_v19 = vpop.permute.xlu0 %3644 }
 0x326   : > { %3307 = vmatpush1.msra.mxu0 %v3297_v12  ;;  %v3299_v14 = vsel %vm611_vm8, %v3294_v8, %v3296_v13  ;;  %3370 = vmatprep.mubr.f32.mxu0 %v4644_v0 }
 0x328   : > { %4155 = vmatmul.mubr.msk.f32.vlgmr.msra.gmra.mrb[18].mxu1 %vm445_vm7, %v3103_v11 }
 0x329   : > { %4158 = vmatpush3.msra.mxu1 %v3299_v14  ;;  %v3471_v16 = vpop.permute.xlu1 %3470  ;;  %4159 = vmatprep.mubr.msk.f32.mxu1 %vm4649_vm5, %v4644_v0  ;;  %v3643_v2 = vpop.permute.xlu0 %3642 }
 0x32a   : > { %v3475_v17 = vsel %vm789_vm9, %v3469_v9, %v3471_v16  ;;  %4162 = vmatprep.subr.mxu1 %v4644_v0  ;;  %v3650_v25 = vsel %vm1145_vm11, %v3643_v2, %v3645_v19 }
 0x32b   : > { %3483 = vmatprep.subr.mxu0 %v3475_v17 }
 0x32d   : > { %4029 = vmatmul.mubr.msk.f32.vlgmr.msra.gmra.mrb[2].mxu0 %vm445_vm7, %v3280_v18  ;;  %v3473_v1 = vpop.permute.xlu1 %3472 }
 0x32e   : > { %3484 = vmatpush1.msra.mxu0 %v3474_v20  ;;  %v3476_v21 = vsel %vm789_vm9, %v3471_v16, %v3473_v1  ;;  %3547 = vmatprep.mubr.f32.mxu0 %v4644_v0 }
 0x330   : > { %4160 = vmatmul.mubr.msk.f32.vlgmr.msra.gmra.mrb[18].mxu1 %vm445_vm7, %v3280_v18 }
 0x331   : > { %4163 = vmatpush3.msra.mxu1 %v3476_v21  ;;  %v3647_v22 = vpop.permute.xlu1 %3646  ;;  %4164 = vmatprep.mubr.msk.f32.mxu1 %vm4649_vm5, %v4644_v0 }
 0x332   : > { %v3651_v24 = vsel %vm1145_vm11, %v3645_v19, %v3647_v22  ;;  %4167 = vmatprep.subr.mxu1 %v4644_v0 }
 0x333   : > { %3659 = vmatprep.subr.mxu0 %v3651_v24 }
 0x335   : > { %4031 = vmatmul.mubr.msk.f32.vlgmr.msra.gmra.mrb[2].mxu0 %vm445_vm7, %v3457_v23  ;;  %v3649_v26 = vpop.permute.xlu1 %3648 }
 0x336   : > { %v3652_v27 = vsel %vm1145_vm11, %v3647_v22, %v3649_v26  ;;  %3660 = vmatpush1.msra.mxu0 %v3650_v25  ;;  %3723 = vmatprep.mubr.f32.mxu0 %v4644_v0 }
 0x338   : > { %4165 = vmatmul.mubr.msk.f32.vlgmr.msra.gmra.mrb[18].mxu1 %vm445_vm7, %v3457_v23 }
 0x339   : > { %4168 = vmatpush3.msra.mxu1 %v3652_v27  ;;  %4169 = vmatprep.mubr.msk.f32.mxu1 %vm4649_vm5, %v4644_v0 }
 0x33a   : > { %v3807_v29 = vpop.permute.xlu0 %3806 }
 0x33d   : > { %4033 = vmatmul.mubr.msk.f32.vlgmr.msra.gmra.mrb[2].mxu0 %vm445_vm7, %v3633_v28 }
 0x340   : > { %4170 = vmatmul.mubr.msk.f32.vlgmr.msra.gmra.mrb[18].mxu1 %vm445_vm7, %v3633_v28 }
 0x410   : > { %v3725_v3 = vpop.f32.mrb[2].mxu0 }
 0x411   : > { %v4172_v7 = vadd.f32 %v3807_v29, %v3725_v3  ;;  %v3727_v30 = vpop.f32.mrb[3].mxu0 }
 0x412   : > { %v4173_v31 = vadd.f32 %v3807_v29, %v3727_v30 }
 0x413   : > { %v3815_v32 = vmul.f32 0.70710677, %v4172_v7  ;;  %v3796_v33 = vpop.f32.mrb[18].mxu1 }
 0x414   : > { %v3816_v34 = vmul.f32 0.70710677, %v4173_v31  ;;  %v4174_v0 = vadd.f32 %v3807_v29, %v3796_v33  ;;  %v4171_v35 = vpop.f32.mrb[19].mxu1 }
 0x415   : > { %3818 = vst [vmem:[%s397_s9] sm:$0xff] %v3815_v32 }
 0x416   : > { %3819 = vst [vmem:[%s397_s9 + $0x8] sm:$0xff] %v3816_v34  ;;  %v3817_v36 = vmul.f32 0.70710677, %v4174_v0 }
 0x418   : > { %3820 = vst [vmem:[%s397_s9 + $0x10] sm:$0xff] %v3817_v36 }
 0x419   : > { %4564 = shalt.err (!%p4561_p8)
}
 0x41a   : > { %s4565_s3 = scalar_lea.hbm %s5251_s15, 384  ;;  %s4569_s17 = scalar_lea.hbm %s5302_s7, 768 }
 0x41b   : > { %p4566_p7 = scmp.ne.s32.totalorder %s5251_s15, %s4565_s3  ;;  %p4570_p12 = scmp.lt.u32.totalorder %s5251_s15, %s5302_s7 }
 0x41c   : > { %p4571_p13 = scmp.lt.u32.totalorder %s4569_s17, %s4565_s3  ;;  %p4573_p3 = scmp.lt.u32.totalorder %s4565_s3, %s5251_s15 }
 0x41d   : > { %p4567_p11 = pnand %p4566_p7, %p5330_p2 }
 0x41e   : > { %p4572_p1 = por %p4571_p13, %p4570_p12 }
 0x41f   : > { %p4568_p4 = pneg %p4567_p11 }
 0x420   : > { %p4574_p6 = por %p4573_p3, %p4572_p1 }
 0x422   : > { %p4575_p10 = pnand %p4574_p6, %p4568_p4 }
 0x424   : > { %4578 = shalt.err (!%p4575_p10)
}
 0x425   : > { %4253 = dma.vmem_to_hbm [thread:$0]  (%p5330_p2), %s5253_s14, 384, %s5251_s15, %s3822_s30  }
 0x426 PF: > { %s3848_s8 = sand.u32 1, %s4621_s24   ;;  %p5331_p5 = scmp.ne.s32.totalorder %s5318_s22, 0 }
 0x427   : > { %p5332_p9 = scmp.ge.s32.totalorder %s4633_s27, 2  ;;  %s3849_s20 = scalar_lea.sflag [#allocation7], %s3848_s8 }
 0x429   : > { %p4279_p0 = pnand %p5332_p9, %p5331_p5 }
 0x42b   : > { %4616 = dma.done.wait (!%p4279_p0), %s3849_s20, 384  }
 0x42c   : > { %4618 = vsyncadd (!%p4279_p0), %s3849_s20, 4294966912  ;;  %p25_p8 = scmp.ge.s32.totalorder %s4860_s11, 4   ;;  %s5333_s24 = smov %s4625_s25 }
 0x42d   : > { %s5334_s25 = smov %s4629_s26  ;;  %s5335_s26 = smov %s4872_s23 }
 0x42e   : > { %s5336_s27 = smov %s4860_s11  ;;  %27 = sbr.rel (!%p25_p8) target bundleno = 13 (0xd), region = 142 }
 0x435   :  { %3854 = vsyncpa [#allocation6], 1 }
 0x436   :  { %3856 = vsyncpa [#allocation6 + $0x1], 1 }
 0x437   :  { %3857 = vsyncpa [#allocation9], 1 }
 0x438   :  { %3859 = vsyncpa [#allocation9 + $0x1], 1 }
 0x439   :  { %3860 = vsyncpa [#allocation12], 1 }
 0x43a   :  { %3861 = vsyncpa [#allocation15], 1 }
 0x43b   :  { %3862 = vsyncpa [#allocation7], 1 }
 0x43c   :  { %3864 = vsyncpa [#allocation7 + $0x1], 1 }

</bundles_post_ra>
